<compile_context>
chip_gen: v6e
topology: v6e:2x2x1
jax: 0.10.0
libtpu: 0.0.40
codegen_flags: <defaults>
</compile_context>

<pallas_src>
import math
import functools

import jax
import jax.numpy as jnp
from jax.experimental import pallas as pl
from jax.experimental.pallas import tpu as pltpu

_F32 = jnp.float32
_BF16 = jnp.bfloat16
_EPS = 1e-5
_GELU_C = math.sqrt(2.0 / math.pi)


# ---------------------------------------------------------------------------
# Small helpers
# ---------------------------------------------------------------------------
def _layernorm(v, g, b):
    mu = jnp.mean(v, axis=-1, keepdims=True)
    var = jnp.mean(jnp.square(v - mu), axis=-1, keepdims=True)
    return (v - mu) * jax.lax.rsqrt(var + _EPS) * g + b


def _vmem_capacity_bytes():
    try:
        return int(pltpu.get_tpu_info().vmem_capacity_bytes)
    except Exception:
        return 64 * 1024 * 1024          # conservative (v7x per-TC) fallback


def _padded_bytes(shape, dtype):
    """VMEM footprint including (8,128) tile padding of the minor two dims."""
    s = [int(d) for d in shape]
    if len(s) == 0:
        s = [1, 1]
    elif len(s) == 1:
        s = [1, s[0]]
    s[-1] = -(-s[-1] // 128) * 128
    s[-2] = -(-s[-2] // 8) * 8
    n = 1
    for d in s:
        n *= d
    return n * jnp.dtype(dtype).itemsize


def _clamp_vmem(desired_bytes):
    cap = _vmem_capacity_bytes()
    ceiling = max(cap - 8 * 1024 * 1024, 16 * 1024 * 1024)   # headroom for compiler scratch
    floor = min(32 * 1024 * 1024, ceiling)
    return int(min(max(desired_bytes, floor), ceiling))


def _weight_spec(arr, single_buffer):
    """Grid-invariant weight operand (2-D grid); single-buffered when possible."""
    nd = arr.ndim
    idx = lambda i, j, _nd=nd: (0,) * _nd
    if single_buffer:
        return pl.BlockSpec(arr.shape, idx, pipeline_mode=pl.Buffered(1))
    return pl.BlockSpec(arr.shape, idx)


def _try_single_buffered(build_fn, *args):
    """Prefer single-buffered weights; fall back if Buffered(1) is rejected."""
    try:
        return build_fn(True)(*args)
    except Exception:
        return build_fn(False)(*args)


# ---------------------------------------------------------------------------
# Kernel A: LayerNorm1 + fused QKV projection (full-width (C,3C) matmul).
# The 1/sqrt(hd) attention scale is folded into the Q columns of W/b in the wrapper.
# ---------------------------------------------------------------------------
def _ln_qkv_kernel(x_ref, ln1g_ref, ln1b_ref, wattn_ref, battn_ref, qkv_ref):
    xn = _layernorm(x_ref[...], ln1g_ref[...], ln1b_ref[...])          # (tm, C) f32
    qkv = jnp.dot(xn.astype(_BF16), wattn_ref[...],
                  preferred_element_type=_F32) + battn_ref[...]          # (tm, 3C) f32
    qkv_ref[...] = qkv.astype(qkv_ref.dtype)


# ---------------------------------------------------------------------------
# Kernel B: flash attention (online softmax), heads batched in one 3-D einsum.
# grid = (B, n_q, n_kv); kv axis is "arbitrary" (sequential accumulation).
# ---------------------------------------------------------------------------
def _flash_attn_kernel(q_ref, k_ref, v_ref, o_ref, m_scr, l_scr, acc_scr, *, tq, tk):
    qi = pl.program_id(1)
    ki = pl.program_id(2)
    q_start = qi * tq
    kv_start = ki * tk

    @pl.when(ki == 0)
    def _init():
        m_scr[...] = jnp.full_like(m_scr, -jnp.inf)
        l_scr[...] = jnp.zeros_like(l_scr)
        acc_scr[...] = jnp.zeros_like(acc_scr)

    def attend(masked):
        # q is already pre-scaled by 1/sqrt(hd) (folded into W_attn in the wrapper).
        s = jnp.einsum('htd,hsd->hts', q_ref[...], k_ref[...],
                       preferred_element_type=_F32)                     # (h, tq, tk)
        if masked:
            rows = q_start + jax.lax.broadcasted_iota(jnp.int32, (tq, tk), 0)
            cols = kv_start + jax.lax.broadcasted_iota(jnp.int32, (tq, tk), 1)
            s = jnp.where((rows >= cols)[None, :, :], s, -jnp.inf)
        m_prev = m_scr[...]                                              # (h, tq, 1)
        m_new = jnp.maximum(m_prev, jnp.max(s, axis=-1, keepdims=True))
        alpha = jnp.exp(m_prev - m_new)
        p = jnp.exp(s - m_new)
        l_scr[...] = alpha * l_scr[...] + jnp.sum(p, axis=-1, keepdims=True)
        acc_scr[...] = alpha * acc_scr[...] + jnp.einsum(
            'hts,hsd->htd', p.astype(_BF16), v_ref[...],
            preferred_element_type=_F32)
        m_scr[...] = m_new

    # fast path: tile strictly below the diagonal -> no mask construction at all
    @pl.when(kv_start + (tk - 1) <= q_start)
    def _unmasked():
        attend(False)

    # diagonal-crossing tiles need the causal mask
    @pl.when(jnp.logical_and(kv_start + (tk - 1) > q_start,
                             kv_start <= q_start + (tq - 1)))
    def _masked():
        attend(True)

    # fully-masked tiles (kv_start > q_start + tq - 1) do nothing; their K/V DMA is
    # already skipped by the clamped index_map in the wrapper.

    @pl.when(ki == pl.num_programs(2) - 1)
    def _finalize():
        inv_l = pl.reciprocal(l_scr[...], approx=True)                  # EUP slot
        o_ref[...] = (acc_scr[...] * inv_l).astype(o_ref.dtype)


# ---------------------------------------------------------------------------
# Kernel C: attention output projection + residual + LN2 + MLP + residual.
# All matmuls full-width (C or 4C), bf16 operands, f32 accumulation.
# ---------------------------------------------------------------------------
def _proj_mlp_kernel(x_ref, y_ref, wproj_ref, bproj_ref, ln2g_ref, ln2b_ref,
                     wfc_ref, bfc_ref, wproj2_ref, bproj2_ref, o_ref):
    att = jnp.dot(y_ref[...], wproj_ref[...],
                  preferred_element_type=_F32) + bproj_ref[...]          # (tm, C)
    x1 = x_ref[...] + att                                                # residual 1

    x1n = _layernorm(x1, ln2g_ref[...], ln2b_ref[...])
    h = jnp.dot(x1n.astype(_BF16), wfc_ref[...],
                preferred_element_type=_F32) + bfc_ref[...]              # (tm, 4C)
    h = 0.5 * h * (1.0 + jnp.tanh(_GELU_C * (h + 0.044715 * h * h * h)))  # GELU(tanh)
    m_out = jnp.dot(h.astype(_BF16), wproj2_ref[...],
                    preferred_element_type=_F32) + bproj2_ref[...]       # (tm, C)

    o_ref[...] = (x1 + m_out).astype(o_ref.dtype)                        # residual 2


# ---------------------------------------------------------------------------
# Wrapper
# ---------------------------------------------------------------------------
def block_forward(x, params, n_head, *, tq=None, tk=None, tm=None):
    B, T, C = x.shape
    assert C % n_head == 0
    hd = C // n_head

    cap = _vmem_capacity_bytes()

    def pick_tile(pref):
        t = pref
        while t > 8 and T % t != 0:
            t //= 2
        return max(min(t, T), 1)

    # bigger row tiles on 128-MiB parts (v5e/v6e); 128 on 64-MiB parts (v7x)
    default_row = 256 if cap >= 96 * 1024 * 1024 else 128
    if tq is None:
        tq = pick_tile(default_row)
    if tk is None:
        tk = pick_tile(default_row)
    if tm is None:
        tm = pick_tile(default_row)
    assert T % tq == 0 and T % tk == 0 and T % tm == 0, "T must be divisible by tiles"
    n_q, n_kv, n_m = T // tq, T // tk, T // tm

    # ---- weight preparation (plain JAX, done once): bf16 matmul operands,
    # ---- 1/sqrt(hd) folded into the Q columns of the fused QKV matrix ----
    scale = 1.0 / math.sqrt(hd)
    col_scale = jnp.concatenate(
        [jnp.full((C,), scale, _F32), jnp.ones((2 * C,), _F32)])

    ln1g = params['ln1_g'].astype(_F32).reshape(1, C)
    ln1b = params['ln1_b'].astype(_F32).reshape(1, C)
    w_attn = (params['w_attn'].astype(_F32) * col_scale[None, :]).astype(_BF16)
    b_attn = params['b_attn'].astype(_F32).reshape(1, 3 * C) * col_scale[None, :]
    w_proj = params['w_proj'].astype(_BF16)
    b_proj = params['b_proj'].astype(_F32).reshape(1, C)
    ln2g = params['ln2_g'].astype(_F32).reshape(1, C)
    ln2b = params['ln2_b'].astype(_F32).reshape(1, C)
    w_fc = params['w_fc'].astype(_BF16)
    b_fc = params['b_fc'].astype(_F32).reshape(1, 4 * C)
    w_proj2 = params['w_proj2'].astype(_BF16)
    b_proj2 = params['b_proj2'].astype(_F32).reshape(1, C)

    # ======================= stage A: LN1 + QKV projection =======================
    a_weights = (ln1g, ln1b, w_attn, b_attn)

    def build_qkv_call(single_buffer):
        in_specs = [pl.BlockSpec((None, tm, C), lambda b, i: (b, i, 0))]
        in_specs += [_weight_spec(w, single_buffer) for w in a_weights]
        w_bytes = sum(_padded_bytes(w.shape, w.dtype) for w in a_weights)
        act = _padded_bytes((tm, C), x.dtype) + _padded_bytes((tm, 3 * C), _BF16)
        interm = _padded_bytes((tm, 3 * C), _F32) + 2 * _padded_bytes((tm, C), _F32)
        vmem = _clamp_vmem(int(1.3 * ((1 if single_buffer else 2) * w_bytes
                                      + 2 * act + interm)) + 4 * 1024 * 1024)
        return pl.pallas_call(
            _ln_qkv_kernel,
            out_shape=jax.ShapeDtypeStruct((B, T, 3 * C), _BF16),
            grid_spec=pltpu.PrefetchScalarGridSpec(
                num_scalar_prefetch=0,
                grid=(B, n_m),
                in_specs=in_specs,
                out_specs=pl.BlockSpec((None, tm, 3 * C), lambda b, i: (b, i, 0)),
            ),
            compiler_params=pltpu.CompilerParams(
                dimension_semantics=("parallel", "parallel"),
                vmem_limit_bytes=vmem),
        )

    qkv = _try_single_buffered(build_qkv_call, x, *a_weights)            # (B, T, 3C) bf16

    # head split in plain JAX (one pass over HBM, no in-kernel lane-splitting reshape)
    q_h = qkv[:, :, 0 * C:1 * C].reshape(B, T, n_head, hd).transpose(0, 2, 1, 3)
    k_h = qkv[:, :, 1 * C:2 * C].reshape(B, T, n_head, hd).transpose(0, 2, 1, 3)
    v_h = qkv[:, :, 2 * C:3 * C].reshape(B, T, n_head, hd).transpose(0, 2, 1, 3)

    # ======================= stage B: flash attention ============================
    def build_attn_call():
        # clamp the kv block index to the last tile the causal mask actually needs,
        # so fully-masked steps re-use the resident K/V block (no new DMA).
        kv_idx = lambda b, q, k: (b, 0, jnp.minimum(k, ((q + 1) * tq - 1) // tk), 0)
        scratch = [pltpu.VMEM((n_head, tq, 1), _F32),     # running max
                   pltpu.VMEM((n_head, tq, 1), _F32),     # running denominator
                   pltpu.VMEM((n_head, tq, hd), _F32)]    # output accumulator
        act = (2 * _padded_bytes((n_head, tq, hd), _BF16)
               + 2 * _padded_bytes((n_head, tk, hd), _BF16))
        scr_b = (2 * _padded_bytes((n_head, tq, 1), _F32)
                 + _padded_bytes((n_head, tq, hd), _F32))
        interm = (2 * _padded_bytes((n_head, tq, tk), _F32)
                  + _padded_bytes((n_head, tq, hd), _F32))
        vmem = _clamp_vmem(int(1.3 * (2 * act + scr_b + interm)) + 4 * 1024 * 1024)
        kern = functools.partial(_flash_attn_kernel, tq=tq, tk=tk)
        return pl.pallas_call(
            kern,
            out_shape=jax.ShapeDtypeStruct((B, n_head, T, hd), _BF16),
            grid_spec=pltpu.PrefetchScalarGridSpec(
                num_scalar_prefetch=0,
                grid=(B, n_q, n_kv),
                in_specs=[
                    pl.BlockSpec((None, n_head, tq, hd), lambda b, q, k: (b, 0, q, 0)),
                    pl.BlockSpec((None, n_head, tk, hd), kv_idx),
                    pl.BlockSpec((None, n_head, tk, hd), kv_idx),
                ],
                out_specs=pl.BlockSpec((None, n_head, tq, hd),
                                       lambda b, q, k: (b, 0, q, 0)),
                scratch_shapes=scratch,
            ),
            compiler_params=pltpu.CompilerParams(
                dimension_semantics=("parallel", "parallel", "arbitrary"),
                vmem_limit_bytes=vmem),
        )

    y_h = build_attn_call()(q_h, k_h, v_h)                               # (B, h, T, hd)

    # head merge in plain JAX -> lane-dense (B, T, C) operand for c_proj
    y = y_h.transpose(0, 2, 1, 3).reshape(B, T, C)

    # ================= stage C: c_proj + residual + LN2 + MLP + residual =========
    c_weights = (w_proj, b_proj, ln2g, ln2b, w_fc, b_fc, w_proj2, b_proj2)

    def build_proj_mlp_call(single_buffer):
        in_specs = [pl.BlockSpec((None, tm, C), lambda b, i: (b, i, 0)),
                    pl.BlockSpec((None, tm, C), lambda b, i: (b, i, 0))]
        in_specs += [_weight_spec(w, single_buffer) for w in c_weights]
        w_bytes = sum(_padded_bytes(w.shape, w.dtype) for w in c_weights)
        act = (_padded_bytes((tm, C), x.dtype) + _padded_bytes((tm, C), _BF16)
               + _padded_bytes((tm, C), x.dtype))
        interm = (2 * _padded_bytes((tm, 4 * C), _F32)
                  + 3 * _padded_bytes((tm, C), _F32))
        vmem = _clamp_vmem(int(1.3 * ((1 if single_buffer else 2) * w_bytes
                                      + 2 * act + interm)) + 4 * 1024 * 1024)
        return pl.pallas_call(
            _proj_mlp_kernel,
            out_shape=jax.ShapeDtypeStruct((B, T, C), x.dtype),
            grid_spec=pltpu.PrefetchScalarGridSpec(
                num_scalar_prefetch=0,
                grid=(B, n_m),
                in_specs=in_specs,
                out_specs=pl.BlockSpec((None, tm, C), lambda b, i: (b, i, 0)),
            ),
            compiler_params=pltpu.CompilerParams(
                dimension_semantics=("parallel", "parallel"),
                vmem_limit_bytes=vmem),
        )

    return _try_single_buffered(build_proj_mlp_call, x, y, *c_weights)


# ---------------------------------------------------------------------------
# Pure-JAX (f32) reference for verification
# ---------------------------------------------------------------------------
def block_reference(x, params, n_head):
    eps = 1e-5
    B, T, C = x.shape
    hd = C // n_head

    def ln(v, g, b):
        mu = jnp.mean(v, axis=-1, keepdims=True)
        var = jnp.mean((v - mu) ** 2, axis=-1, keepdims=True)
        return (v - mu) / jnp.sqrt(var + eps) * g + b

    xn = ln(x, params["ln1_g"], params["ln1_b"])
    qkv = xn @ params["w_attn"] + params["b_attn"]
    q, k, v = jnp.split(qkv, 3, axis=-1)
    q = q.reshape(B, T, n_head, hd).transpose(0, 2, 1, 3)
    k = k.reshape(B, T, n_head, hd).transpose(0, 2, 1, 3)
    v = v.reshape(B, T, n_head, hd).transpose(0, 2, 1, 3)
    att = (q @ k.transpose(0, 1, 3, 2)) / math.sqrt(hd)
    mask = jnp.tril(jnp.ones((T, T), bool))
    att = jnp.where(mask, att, -jnp.inf)
    att = jax.nn.softmax(att, axis=-1)
    y = (att @ v).transpose(0, 2, 1, 3).reshape(B, T, C)
    y = y @ params["w_proj"] + params["b_proj"]
    x1 = x + y

    x1n = ln(x1, params["ln2_g"], params["ln2_b"])
    h = x1n @ params["w_fc"] + params["b_fc"]
    h = 0.5 * h * (1.0 + jnp.tanh(math.sqrt(2.0 / math.pi) * (h + 0.044715 * h ** 3)))
    m = h @ params["w_proj2"] + params["b_proj2"]
    return x1 + m


# ---------------------------------------------------------------------------
if __name__ == "__main__":
    B, T, C, n_head = 2, 128, 256, 4   # small but lane-aligned (C multiple of 128)

    key = jax.random.PRNGKey(0)
    ks = jax.random.split(key, 8)

    params = {
        "ln1_g":   jnp.ones((1, C), jnp.float32),
        "ln1_b":   jnp.zeros((1, C), jnp.float32),
        "w_attn":  0.02 * jax.random.normal(ks[0], (C, 3 * C), jnp.float32),
        "b_attn":  0.01 * jax.random.normal(ks[5], (1, 3 * C), jnp.float32),
        "w_proj":  0.02 * jax.random.normal(ks[1], (C, C), jnp.float32),
        "b_proj":  0.01 * jax.random.normal(ks[6], (1, C), jnp.float32),
        "ln2_g":   jnp.ones((1, C), jnp.float32),
        "ln2_b":   jnp.zeros((1, C), jnp.float32),
        "w_fc":    0.02 * jax.random.normal(ks[2], (C, 4 * C), jnp.float32),
        "b_fc":    0.01 * jax.random.normal(ks[7], (1, 4 * C), jnp.float32),
        "w_proj2": 0.02 * jax.random.normal(ks[3], (4 * C, C), jnp.float32),
        "b_proj2": jnp.zeros((1, C), jnp.float32),
    }

    x = jax.random.normal(ks[4], (B, T, C), jnp.float32)

    # tq=tk=tm=64 exercises the multi-tile path (masked / unmasked / skipped kv tiles)
    out = block_forward(x, params, n_head, tq=64, tk=64, tm=64)
    out = jax.block_until_ready(out)

    ref = block_reference(x, params, n_head)
    assert out.shape == ref.shape
    # bf16 matmul operands with f32 accumulation + approx reciprocal -> loose tolerance
    assert jnp.allclose(out, ref, rtol=2e-2, atol=2e-2), "mismatch vs reference"

    print("KERNEL_OK")
</pallas_src>

<mosaic_0001>
module attributes {stable_mosaic.version = 11 : i64} {
  func.func @_ln_qkv_kernel(%arg0: i32, %arg1: i32, %arg2: memref<1x64x256xf32, #tpu.memory_space<vmem>>, %arg3: memref<1x256xf32, #tpu.memory_space<vmem>>, %arg4: memref<1x256xf32, #tpu.memory_space<vmem>>, %arg5: memref<256x768xbf16, #tpu.memory_space<vmem>>, %arg6: memref<1x768xf32, #tpu.memory_space<vmem>>, %arg7: memref<1x64x768xbf16, #tpu.memory_space<vmem>>) attributes {dimension_semantics = [#tpu.dimension_semantics<parallel>, #tpu.dimension_semantics<parallel>], iteration_bounds = array<i64: 2, 2>, scalar_prefetch = 0 : i64, scratch_operands = 0 : i64, tpu.core_type = #tpu.core_type<tc>, window_params = [{transform_indices = @transform_0, window_bounds = array<i64: 1, 64, 256>}, {pipeline_mode = #tpu.pipeline_mode<synchronous>, transform_indices = @transform_1, window_bounds = array<i64: 1, 256>}, {pipeline_mode = #tpu.pipeline_mode<synchronous>, transform_indices = @transform_2, window_bounds = array<i64: 1, 256>}, {pipeline_mode = #tpu.pipeline_mode<synchronous>, transform_indices = @transform_3, window_bounds = array<i64: 256, 768>}, {pipeline_mode = #tpu.pipeline_mode<synchronous>, transform_indices = @transform_4, window_bounds = array<i64: 1, 768>}, {transform_indices = @transform_5, window_bounds = array<i64: 1, 64, 768>}]} {
    %c0 = arith.constant 0 : index
    %c0_0 = arith.constant 0 : index
    %c0_1 = arith.constant 0 : index
    %0 = vector.load %arg2[%c0, %c0_0, %c0_1] : memref<1x64x256xf32, #tpu.memory_space<vmem>>, vector<1x64x256xf32>
    %1 = vector.shape_cast %0 : vector<1x64x256xf32> to vector<64x256xf32>
    %c0_2 = arith.constant 0 : index
    %c0_3 = arith.constant 0 : index
    %2 = vector.load %arg3[%c0_2, %c0_3] : memref<1x256xf32, #tpu.memory_space<vmem>>, vector<1x256xf32>
    %c0_4 = arith.constant 0 : index
    %c0_5 = arith.constant 0 : index
    %3 = vector.load %arg4[%c0_4, %c0_5] : memref<1x256xf32, #tpu.memory_space<vmem>>, vector<1x256xf32>
    %cst = arith.constant dense<0.000000e+00> : vector<64xf32>
    %4 = vector.multi_reduction <add>, %1, %cst [1] : vector<64x256xf32> to vector<64xf32>
    %5 = vector.shape_cast %4 : vector<64xf32> to vector<64x1xf32>
    %cst_6 = arith.constant 2.560000e+02 : f32
    %6 = vector.broadcast %cst_6 : f32 to vector<64x1xf32>
    %7 = arith.divf %5, %6 : vector<64x1xf32>
    %8 = vector.broadcast %7 : vector<64x1xf32> to vector<64x256xf32>
    %9 = arith.subf %1, %8 : vector<64x256xf32>
    %10 = arith.mulf %9, %9 : vector<64x256xf32>
    %cst_7 = arith.constant dense<0.000000e+00> : vector<64xf32>
    %11 = vector.multi_reduction <add>, %10, %cst_7 [1] : vector<64x256xf32> to vector<64xf32>
    %12 = vector.shape_cast %11 : vector<64xf32> to vector<64x1xf32>
    %cst_8 = arith.constant 2.560000e+02 : f32
    %13 = vector.broadcast %cst_8 : f32 to vector<64x1xf32>
    %14 = arith.divf %12, %13 : vector<64x1xf32>
    %15 = vector.broadcast %7 : vector<64x1xf32> to vector<64x256xf32>
    %16 = arith.subf %1, %15 : vector<64x256xf32>
    %cst_9 = arith.constant 9.99999974E-6 : f32
    %17 = vector.broadcast %cst_9 : f32 to vector<64x1xf32>
    %18 = arith.addf %14, %17 : vector<64x1xf32>
    %19 = math.rsqrt %18 : vector<64x1xf32>
    %20 = vector.broadcast %19 : vector<64x1xf32> to vector<64x256xf32>
    %21 = arith.mulf %16, %20 : vector<64x256xf32>
    %22 = vector.broadcast %2 : vector<1x256xf32> to vector<64x256xf32>
    %23 = arith.mulf %21, %22 : vector<64x256xf32>
    %24 = vector.broadcast %3 : vector<1x256xf32> to vector<64x256xf32>
    %25 = arith.addf %23, %24 : vector<64x256xf32>
    %26 = arith.truncf %25 : vector<64x256xf32> to vector<64x256xbf16>
    %c0_10 = arith.constant 0 : index
    %c0_11 = arith.constant 0 : index
    %27 = vector.load %arg5[%c0_10, %c0_11] : memref<256x768xbf16, #tpu.memory_space<vmem>>, vector<256x768xbf16>
    %cst_12 = arith.constant dense<0.000000e+00> : vector<64x768xf32>
    %28 = tpu.matmul %26, %27, %cst_12 {dimension_numbers = #tpu.dot_dimension_numbers<[1], [0], [0], [1], [0, 0, 1, 1], [], []>} : vector<64x256xbf16>, vector<256x768xbf16>, vector<64x768xf32> -> vector<64x768xf32>
    %c0_13 = arith.constant 0 : index
    %c0_14 = arith.constant 0 : index
    %29 = vector.load %arg6[%c0_13, %c0_14] : memref<1x768xf32, #tpu.memory_space<vmem>>, vector<1x768xf32>
    %30 = vector.broadcast %29 : vector<1x768xf32> to vector<64x768xf32>
    %31 = arith.addf %28, %30 : vector<64x768xf32>
    %32 = arith.truncf %31 : vector<64x768xf32> to vector<64x768xbf16>
    %c0_15 = arith.constant 0 : index
    %c0_16 = arith.constant 0 : index
    %c0_17 = arith.constant 0 : index
    %33 = vector.load %arg7[%c0_15, %c0_16, %c0_17] : memref<1x64x768xbf16, #tpu.memory_space<vmem>>, vector<1x64x768xbf16>
    %34 = vector.shape_cast %33 : vector<1x64x768xbf16> to vector<64x768xbf16>
    %35 = vector.shape_cast %32 : vector<64x768xbf16> to vector<1x64x768xbf16>
    tpu.vector_store %arg7[%c0_15, %c0_16, %c0_17], %35 {strides = array<i32>} : memref<1x64x768xbf16, #tpu.memory_space<vmem>>, vector<1x64x768xbf16>,
    return
  }
  func.func @transform_0(%arg0: i32, %arg1: i32) -> (i32, i32, i32) {
    %c0_i32 = arith.constant 0 : i32
    %c0_i32_0 = arith.constant 0 : i32
    return %arg0, %arg1, %c0_i32 : i32, i32, i32
  }
  func.func @transform_1(%arg0: i32, %arg1: i32) -> (i32, i32) {
    %c0_i32 = arith.constant 0 : i32
    %c0_i32_0 = arith.constant 0 : i32
    %c0_i32_1 = arith.constant 0 : i32
    return %c0_i32, %c0_i32_0 : i32, i32
  }
  func.func @transform_2(%arg0: i32, %arg1: i32) -> (i32, i32) {
    %c0_i32 = arith.constant 0 : i32
    %c0_i32_0 = arith.constant 0 : i32
    %c0_i32_1 = arith.constant 0 : i32
    return %c0_i32, %c0_i32_0 : i32, i32
  }
  func.func @transform_3(%arg0: i32, %arg1: i32) -> (i32, i32) {
    %c0_i32 = arith.constant 0 : i32
    %c0_i32_0 = arith.constant 0 : i32
    %c0_i32_1 = arith.constant 0 : i32
    return %c0_i32, %c0_i32_0 : i32, i32
  }
  func.func @transform_4(%arg0: i32, %arg1: i32) -> (i32, i32) {
    %c0_i32 = arith.constant 0 : i32
    %c0_i32_0 = arith.constant 0 : i32
    %c0_i32_1 = arith.constant 0 : i32
    return %c0_i32, %c0_i32_0 : i32, i32
  }
  func.func @transform_5(%arg0: i32, %arg1: i32) -> (i32, i32, i32) {
    %c0_i32 = arith.constant 0 : i32
    %c0_i32_0 = arith.constant 0 : i32
    return %arg0, %arg1, %c0_i32 : i32, i32, i32
  }
}

module attributes {stable_mosaic.version = 11 : i64} {
  func.func @_ln_qkv_kernel(%arg0: i32, %arg1: i32, %arg2: memref<1x64x256xf32, #tpu.memory_space<vmem>>, %arg3: memref<1x256xf32, #tpu.memory_space<vmem>>, %arg4: memref<1x256xf32, #tpu.memory_space<vmem>>, %arg5: memref<256x768xbf16, #tpu.memory_space<vmem>>, %arg6: memref<1x768xf32, #tpu.memory_space<vmem>>, %arg7: memref<1x64x768xbf16, #tpu.memory_space<vmem>>) attributes {dimension_semantics = [#tpu.dimension_semantics<parallel>, #tpu.dimension_semantics<parallel>], iteration_bounds = array<i64: 2, 2>, scalar_prefetch = 0 : i64, scratch_operands = 0 : i64, tpu.core_type = #tpu.core_type<tc>, window_params = [{transform_indices = @transform_0, window_bounds = array<i64: 1, 64, 256>}, {pipeline_mode = #tpu.pipeline_mode<synchronous>, transform_indices = @transform_1, window_bounds = array<i64: 1, 256>}, {pipeline_mode = #tpu.pipeline_mode<synchronous>, transform_indices = @transform_2, window_bounds = array<i64: 1, 256>}, {pipeline_mode = #tpu.pipeline_mode<synchronous>, transform_indices = @transform_3, window_bounds = array<i64: 256, 768>}, {pipeline_mode = #tpu.pipeline_mode<synchronous>, transform_indices = @transform_4, window_bounds = array<i64: 1, 768>}, {transform_indices = @transform_5, window_bounds = array<i64: 1, 64, 768>}]} {
    %c0 = arith.constant 0 : index
    %c0_0 = arith.constant 0 : index
    %c0_1 = arith.constant 0 : index
    %0 = vector.load %arg2[%c0, %c0_0, %c0_1] : memref<1x64x256xf32, #tpu.memory_space<vmem>>, vector<1x64x256xf32>
    %1 = vector.shape_cast %0 : vector<1x64x256xf32> to vector<64x256xf32>
    %c0_2 = arith.constant 0 : index
    %c0_3 = arith.constant 0 : index
    %2 = vector.load %arg3[%c0_2, %c0_3] : memref<1x256xf32, #tpu.memory_space<vmem>>, vector<1x256xf32>
    %c0_4 = arith.constant 0 : index
    %c0_5 = arith.constant 0 : index
    %3 = vector.load %arg4[%c0_4, %c0_5] : memref<1x256xf32, #tpu.memory_space<vmem>>, vector<1x256xf32>
    %cst = arith.constant dense<0.000000e+00> : vector<64xf32>
    %4 = vector.multi_reduction <add>, %1, %cst [1] : vector<64x256xf32> to vector<64xf32>
    %5 = vector.shape_cast %4 : vector<64xf32> to vector<64x1xf32>
    %cst_6 = arith.constant 2.560000e+02 : f32
    %6 = vector.broadcast %cst_6 : f32 to vector<64x1xf32>
    %7 = arith.divf %5, %6 : vector<64x1xf32>
    %8 = vector.broadcast %7 : vector<64x1xf32> to vector<64x256xf32>
    %9 = arith.subf %1, %8 : vector<64x256xf32>
    %10 = arith.mulf %9, %9 : vector<64x256xf32>
    %cst_7 = arith.constant dense<0.000000e+00> : vector<64xf32>
    %11 = vector.multi_reduction <add>, %10, %cst_7 [1] : vector<64x256xf32> to vector<64xf32>
    %12 = vector.shape_cast %11 : vector<64xf32> to vector<64x1xf32>
    %cst_8 = arith.constant 2.560000e+02 : f32
    %13 = vector.broadcast %cst_8 : f32 to vector<64x1xf32>
    %14 = arith.divf %12, %13 : vector<64x1xf32>
    %15 = vector.broadcast %7 : vector<64x1xf32> to vector<64x256xf32>
    %16 = arith.subf %1, %15 : vector<64x256xf32>
    %cst_9 = arith.constant 9.99999974E-6 : f32
    %17 = vector.broadcast %cst_9 : f32 to vector<64x1xf32>
    %18 = arith.addf %14, %17 : vector<64x1xf32>
    %19 = math.rsqrt %18 : vector<64x1xf32>
    %20 = vector.broadcast %19 : vector<64x1xf32> to vector<64x256xf32>
    %21 = arith.mulf %16, %20 : vector<64x256xf32>
    %22 = vector.broadcast %2 : vector<1x256xf32> to vector<64x256xf32>
    %23 = arith.mulf %21, %22 : vector<64x256xf32>
    %24 = vector.broadcast %3 : vector<1x256xf32> to vector<64x256xf32>
    %25 = arith.addf %23, %24 : vector<64x256xf32>
    %26 = arith.truncf %25 : vector<64x256xf32> to vector<64x256xbf16>
    %c0_10 = arith.constant 0 : index
    %c0_11 = arith.constant 0 : index
    %27 = vector.load %arg5[%c0_10, %c0_11] : memref<256x768xbf16, #tpu.memory_space<vmem>>, vector<256x768xbf16>
    %cst_12 = arith.constant dense<0.000000e+00> : vector<64x768xf32>
    %28 = tpu.matmul %26, %27, %cst_12 {dimension_numbers = #tpu.dot_dimension_numbers<[1], [0], [0], [1], [0, 0, 1, 1], [], []>} : vector<64x256xbf16>, vector<256x768xbf16>, vector<64x768xf32> -> vector<64x768xf32>
    %c0_13 = arith.constant 0 : index
    %c0_14 = arith.constant 0 : index
    %29 = vector.load %arg6[%c0_13, %c0_14] : memref<1x768xf32, #tpu.memory_space<vmem>>, vector<1x768xf32>
    %30 = vector.broadcast %29 : vector<1x768xf32> to vector<64x768xf32>
    %31 = arith.addf %28, %30 : vector<64x768xf32>
    %32 = arith.truncf %31 : vector<64x768xf32> to vector<64x768xbf16>
    %c0_15 = arith.constant 0 : index
    %c0_16 = arith.constant 0 : index
    %c0_17 = arith.constant 0 : index
    %33 = vector.load %arg7[%c0_15, %c0_16, %c0_17] : memref<1x64x768xbf16, #tpu.memory_space<vmem>>, vector<1x64x768xbf16>
    %34 = vector.shape_cast %33 : vector<1x64x768xbf16> to vector<64x768xbf16>
    %35 = vector.shape_cast %32 : vector<64x768xbf16> to vector<1x64x768xbf16>
    tpu.vector_store %arg7[%c0_15, %c0_16, %c0_17], %35 {strides = array<i32>} : memref<1x64x768xbf16, #tpu.memory_space<vmem>>, vector<1x64x768xbf16>,
    return
  }
  func.func @transform_0(%arg0: i32, %arg1: i32) -> (i32, i32, i32) {
    %c0_i32 = arith.constant 0 : i32
    %c0_i32_0 = arith.constant 0 : i32
    return %arg0, %arg1, %c0_i32 : i32, i32, i32
  }
  func.func @transform_1(%arg0: i32, %arg1: i32) -> (i32, i32) {
    %c0_i32 = arith.constant 0 : i32
    %c0_i32_0 = arith.constant 0 : i32
    %c0_i32_1 = arith.constant 0 : i32
    return %c0_i32, %c0_i32_0 : i32, i32
  }
  func.func @transform_2(%arg0: i32, %arg1: i32) -> (i32, i32) {
    %c0_i32 = arith.constant 0 : i32
    %c0_i32_0 = arith.constant 0 : i32
    %c0_i32_1 = arith.constant 0 : i32
    return %c0_i32, %c0_i32_0 : i32, i32
  }
  func.func @transform_3(%arg0: i32, %arg1: i32) -> (i32, i32) {
    %c0_i32 = arith.constant 0 : i32
    %c0_i32_0 = arith.constant 0 : i32
    %c0_i32_1 = arith.constant 0 : i32
    return %c0_i32, %c0_i32_0 : i32, i32
  }
  func.func @transform_4(%arg0: i32, %arg1: i32) -> (i32, i32) {
    %c0_i32 = arith.constant 0 : i32
    %c0_i32_0 = arith.constant 0 : i32
    %c0_i32_1 = arith.constant 0 : i32
    return %c0_i32, %c0_i32_0 : i32, i32
  }
  func.func @transform_5(%arg0: i32, %arg1: i32) -> (i32, i32, i32) {
    %c0_i32 = arith.constant 0 : i32
    %c0_i32_0 = arith.constant 0 : i32
    return %arg0, %arg1, %c0_i32 : i32, i32, i32
  }
}

</mosaic_0001>

<bundles_post_ra>
// kernel: tpu_custom_call.1
= control target key start
LH: loop header
LB: loop body
LE: loop exit
PB: predicated region body
PF: predicated region fallthrough
CT: control target
= control target key end

     0   :  { %s2925_s0 = inlined_call_operand.hbm [shape: f32[2,128,256], index: 0, kind: input, shape index: {}]   ;;  %s2926_s1 = inlined_call_operand.hbm [shape: f32[1,256], index: 1, kind: input, shape index: {}]   ;;  %s2927_s2 = inlined_call_operand.hbm [shape: f32[1,256], index: 2, kind: input, shape index: {}]   ;;  %s2928_s3 = inlined_call_operand.hbm [shape: bf16[256,768], index: 3, kind: input, shape index: {}]   ;;  %s2929_s4 = inlined_call_operand.vmem [shape: f32[1,768], index: 4, kind: input, shape index: {}]   ;;  %s2930_s5 = inlined_call_operand.hbm [shape: bf16[2,128,768], index: 5, kind: output, shape index: {}]  }
   0x1   :  { %2939 = sst [smem:[#allocation19_spill]] %s2926_s1 }
   0x2   :  { %2940 = sst [smem:[#allocation20_spill]] %s2927_s2 }
   0x3   :  { %2941 = sst [smem:[#allocation21_spill]] %s2928_s3 }
   0x4   :  { %10 = vsyncpa [#allocation3], 0 }
   0x5   :  { %12 = vsyncpa [#allocation3 + $0x1], 0 }
   0x6   :  { %13 = vsyncpa [#allocation6], 0 }
   0x7   :  { %14 = vsyncpa [#allocation9], 0 }
   0x8   :  { %15 = vsyncpa [#allocation4], 0 }
   0x9   :  { %17 = vsyncpa [#allocation4 + $0x1], 0  ;;  %s2374_s18 = smov 0   ;;  %s2376_s19 = smov 0  }
   0xa   :  { %s2378_s20 = smov 0   ;;  %s2380_s21 = smov 0  }
   0xb   :  { %s2382_s22 = smov 0   ;;  %s2384_s23 = smov 0  }
   0xc   :  { %s2386_s24 = smov 0   ;;  %s2388_s25 = smov 0  }
   0xd LB: > { %2942 = sst [smem:[#allocation15_spill]] %s2303_s18  ;;  %s1644_s26 = sadd.s32 4294967295, %s2331_s25   ;;  %s2331_s25 = sphi %s2388_s25, %s23_s25   ;;  %s2327_s24 = sphi %s2386_s24, %s2971_s24   ;;  %s2323_s23 = sphi %s2384_s23, %s2966_s23   ;;  %s2319_s22 = sphi %s2382_s22, %s2970_s22   ;;  %s2315_s21 = sphi %s2380_s21, %s2965_s21   ;;  %s2311_s20 = sphi %s2378_s20, %s2969_s20   ;;  %s2307_s19 = sphi %s2376_s19, %s2968_s19   ;;  %s2303_s18 = sphi %s2374_s18, %s2967_s18  }
   0xe   : > { %2943 = sst [smem:[#allocation16_spill]] %s2323_s23  ;;  %s1645_s27 = sadd.s32 4294967294, %s2331_s25  }
   0xf   : > { %p57_p0 = scmp.ne.s32.totalorder %s2307_s19, %s2303_s18  ;;  %p2418_p1 = scmp.eq.s32.totalorder %s1644_s26, 0 }
  0x10   : > { %p2422_p2 = scmp.eq.s32.totalorder %s1644_s26, 3  ;;  %p173_p3 = scmp.eq.s32.totalorder %s1645_s27, 3 }
  0x11   : > { %s2944_s28 = scalar_select %p2418_p1, 1, 0 }
  0x12   : > { %s2945_s29 = scalar_select %p2422_p2, 1, 0 }
  0x13   : > { %p2428_p4 = por %p2418_p1, %p57_p0  ;;  %p1646_p5 = scmp.ge.s32.totalorder %s2331_s25, 1 }
  0x14   : > { %p2433_p6 = por %p173_p3, %p57_p0  ;;  %p180_p7 = scmp.lt.s32.totalorder %s2331_s25, 5 }
  0x15   : > { %s2946_s30 = scalar_select %p2428_p4, 1, 0 }
  0x16   : > { %s2947_s6 = scalar_select %p2433_p6, 1, 0 }
  0x17   : > { %p2438_p8 = pnand %p1646_p5, %p180_p7  ;;  %s2333_s8 = smov [#allocation5]  }
  0x18   : > { %2948 = sst [smem:[#allocation17_spill]] %s2947_s6  ;;  %s193_s9 = sshll.u32 %s2333_s8, 4  ;;  %s194_s9 = int_to_ptr.vmem [resolvable:$true] %s193_s9 }
  0x19   : > { %s2949_s7 = scalar_select %p2438_p8, 1, 0 }
  0x1a   : > { %p1862_p9 = pneg %p2438_p8  ;;  %s2334_s10 = smov [#allocation7]  }
  0x1b   : > { %s204_s11 = sshll.u32 %s2334_s10, 4  ;;  %s2335_s13 = smov [#allocation8]   ;;  %s205_s11 = int_to_ptr.vmem [resolvable:$true] %s204_s11 }
  0x1c   : > { %p2446_p10 = pnand %p1862_p9, %p2418_p1  ;;  %s214_s14 = sshll.u32 %s2335_s13, 4  ;;  %s2450_s14 = int_to_ptr.vmem [resolvable:$true] %s214_s14 }
  0x1d   : > { %s2132_s15 = scalar_lea.vmem %s194_s9, 32  ;;  %p2140_p3 = scmp.lt.s32.totalorder %s194_s9, %s194_s9 }
  0x1e   : > { %p2123_p11 = pneg %p2446_p10  ;;  %p2133_p12 = scmp.ne.s32.totalorder %s194_s9, %s2132_s15 }
  0x1f   : > { %p2141_p5 = scmp.lt.s32.totalorder %s2132_s15, %s2132_s15 }
  0x20   : > { %p2135_p13 = pnand %p2133_p12, %p2123_p11 }
  0x21   : > { %p2142_p7 = por %p2141_p5, %p2140_p3 }
  0x22   : > { %p2136_p0 = pneg %p2135_p13 }
  0x24   : > { %p2143_p9 = pnand %p2142_p7, %p2136_p0 }
  0x26   : > { %2146 = shalt.err (!%p2143_p9)
}
  0x27   : > { %s2951_s1 = sld [smem:[#allocation19_spill]]  ;;  %s2158_s26 = scalar_lea.vmem %s205_s11, 32 }
  0x28   : > { %p2159_p6 = scmp.ne.s32.totalorder %s205_s11, %s2158_s26  ;;  %p2166_p12 = scmp.lt.s32.totalorder %s205_s11, %s205_s11 }
  0x29   : > { %p2167_p13 = scmp.lt.s32.totalorder %s2158_s26, %s2158_s26 }
  0x2a   : > { %p2161_p1 = pnand %p2159_p6, %p2123_p11 }
  0x2b   : > { %p2168_p8 = por %p2167_p13, %p2166_p12 }
  0x2c   : > { %p2162_p4 = pneg %p2161_p1 }
  0x2d   : > { %1865 = dma.hbm_to_vmem [thread:$0]  (!%p2446_p10), %s2951_s1, 32, %s194_s9, [#allocation6]  }
  0x2e   : > { %p2169_p2 = pnand %p2168_p8, %p2162_p4 }
  0x30   : > { %2172 = shalt.err (!%p2169_p2)
}
  0x31   : > { %s2952_s2 = sld [smem:[#allocation20_spill]]  ;;  %s2184_s9 = scalar_lea.vmem %s2450_s14, 12288 }
  0x32   : > { %p2185_p0 = scmp.ne.s32.totalorder %s2450_s14, %s2184_s9  ;;  %p2192_p3 = scmp.lt.s32.totalorder %s2450_s14, %s2450_s14 }
  0x33   : > { %p2193_p4 = scmp.lt.s32.totalorder %s2184_s9, %s2184_s9 }
  0x34   : > { %p2187_p1 = pnand %p2185_p0, %p2123_p11 }
  0x35   : > { %p2194_p2 = por %p2193_p4, %p2192_p3 }
  0x36   : > { %p2188_p6 = pneg %p2187_p1 }
  0x37   : > { %1868 = dma.hbm_to_vmem [thread:$0]  (!%p2446_p10), %s2952_s2, 32, %s205_s11, [#allocation6]  }
  0x38   : > { %p2195_p8 = pnand %p2194_p2, %p2188_p6 }
  0x3a   : > { %2198 = shalt.err (!%p2195_p8)
}
  0x3b   : > { %s2336_s10 = smov 384   ;;  %s2337_s11 = smov 24  }
  0x3c   : > { %s2953_s3 = sld [smem:[#allocation21_spill]]  ;;  %s32_s16 = sadd.s32 1, %s2323_s23 }
  0x3d   : > { %p33_p11 = scmp.ge.s32.totalorder %s32_s16, 2  ;;  %s35_s17 = sadd.s32 1, %s2327_s24 }
  0x3e   : > { %s44_s26 = sadd.s32 1, %s2311_s20  ;;  %p51_p5 = scmp.ne.s32.totalorder %s2311_s20, %s2307_s19 }
  0x3f   : > { %s2973_s16 = smov (%p33_p11, %s32_s16), 0  ;;  %s2975_s17 = smov (!%p33_p11, %s35_s17), %s2327_s24 }
  0x40   : > { %2954 = sst [smem:[#allocation18_spill]] %s2973_s16  ;;  %s40_s27 = ssub.s32 %s2323_s23, %s2973_s16 }
  0x41   : > { %p52_p7 = scmp.eq.s32.totalorder %s2331_s25, 0  ;;  %p37_p9 = scmp.ge.s32.totalorder %s2975_s17, 2 }
  0x42   : > { %1871 = dma.hbm_to_vmem [thread:$0]  (!%p2446_p10), %s2953_s3, 12288, %s2450_s14, [#allocation9], %s2336_s10, %s2336_s10, %s2337_s11  }
  0x43   : > { %p2955_p12 = scmp.ne.s32.totalorder %s2945_s29, 0  ;;  %p2500_p10 = por %p52_p7, %p51_p5 }
  0x44   : > { %p1883_p0 = scmp.lt.s32.totalorder %s2331_s25, 4  ;;  %s2977_s17 = smov (%p37_p9, %s2975_s17), 0 }
  0x45   : > { %p2496_p13 = por %p2955_p12, %p51_p5  ;;  %s231_s8 = sand.u32 1, %s2311_s20  }
  0x46   : > { %s1786_s9 = sshll.u32 %s2323_s23, 4  ;;  %s39_s10 = ssub.s32 %s2327_s24, %s2977_s17 }
  0x47   : > { %s41_s11 = sor.u32 %s40_s27, %s39_s10  ;;  %s1651_s13 = sshll.u32 %s231_s8, 7 }
  0x48   : > { %p42_p1 = scmp.eq.s32.totalorder %s41_s11, 0  ;;  %s1654_s29 = sshll.u32 %s2327_s24, 5 }
  0x49   : > { %s235_s15 = scalar_lea.vmem [#allocation2], %s1651_s13  ;;  %s242_s3 = sadd.s32 %s1786_s9, %s1654_s29 }
  0x4a   : > { %s245_s1 = sshll.u32 %s235_s15, 4  ;;  %s1655_s16 = sshll.u32 %s242_s3, 7  ;;  %s246_s1 = int_to_ptr.vmem [resolvable:$true] %s245_s1 }
  0x4b   : > { %s2513_s2 = scalar_select %p42_p1, %s2311_s20, %s44_s26  }
  0x4c   : > { %p2519_p6 = pnand %p1883_p0, %p2500_p10  ;;  %s244_s27 = scalar_lea.hbm %s2925_s0, %s1655_s16 }
  0x4d   : > { %s232_s10 = scalar_lea.sflag [#allocation3], %s231_s8  ;;  %s2212_s11 = scalar_lea.vmem %s246_s1, 2048 }
  0x4e   : > { %p2201_p3 = pneg %p2519_p6  ;;  %p2213_p4 = scmp.ne.s32.totalorder %s246_s1, %s2212_s11 }
  0x4f   : > { %s2338_s26 = smov [#allocation2]  }
  0x50   : > { %p2215_p2 = pnand %p2213_p4, %p2201_p3  ;;  %s2217_s3 = sshll.u32 %s2338_s26, 4  ;;  %s2218_s3 = int_to_ptr.vmem [resolvable:$false] %s2217_s3 }
  0x51   : > { %s2219_s14 = scalar_lea.vmem %s2218_s3, 4096  ;;  %p2220_p11 = scmp.lt.s32.totalorder %s246_s1, %s2218_s3 }
  0x52   : > { %p2216_p8 = pneg %p2215_p2  ;;  %p2221_p5 = scmp.lt.s32.totalorder %s2219_s14, %s2212_s11 }
  0x54   : > { %p2222_p7 = por %p2221_p5, %p2220_p11 }
  0x56   : > { %p2223_p9 = pnand %p2222_p7, %p2216_p8 }
  0x58   : > { %2226 = shalt.err (!%p2223_p9)
}
  0x59   : > { %s2339_s9 = smov 256   ;;  %s2340_s18 = smov 16  }
  0x5a   : > { %1875 = dma.hbm_to_vmem [thread:$0]  (!%p2519_p6), %s244_s27, 2048, %s246_s1, %s232_s10, %s2339_s9, %s2339_s9, %s2340_s18  }
  0x5b   : > { %p2959_p12 = scmp.ne.s32.totalorder %s2949_s7, 0 }
  0x5c   : > { %s2533_s23 = sand.u32 (!%p2959_p12), 1, %s2307_s19   ;;  %p2960_p10 = scmp.ne.s32.totalorder (!%p2959_p12), %s2946_s30, 0 }
  0x5d   : > { %257 = sbr.rel (%p2959_p12) target bundleno = 711 (0x2c7), region = 40  ;;  %s1657_s16 = sshll.u32 (!%p2959_p12), %s2533_s23, 7 }
  0x5e   : > { %s260_s8 = scalar_lea.sflag (!%p2959_p12), [#allocation3], %s2533_s23  ;;  %s263_s13 = scalar_lea.vmem (!%p2959_p12), [#allocation2], %s1657_s16 }
  0x62   : > { %2286 = dma.done.wait (%p2960_p10), %s260_s8, 2048  }
  0x63   : > { %2288 = vsyncadd (%p2960_p10), %s260_s8, 4294965248  ;;  %p2961_p0 = scmp.ne.s32.totalorder %s2944_s28, 0 }
  0x65   : > { %2290 = dma.done.wait (%p2961_p0), [#allocation6], 64  }
  0x66   : > { %2292 = vsyncadd (%p2961_p0), [#allocation6], 4294967232 }
  0x67   : > { %2294 = dma.done.wait (%p2961_p0), [#allocation9], 12288  }
  0x68   : > { %2296 = vsyncadd (%p2961_p0), [#allocation9], 4294955008  ;;  %v2549_v0 = vld [vmem:[%s263_s13] sm:$0xff]  ;;  %v2551_v1 = vld [vmem:[%s263_s13 + $0x8] sm:$0xff]  ;;  %s1843_s30 = smul.u32 192, %s2533_s23  ;;  %s1509_s26 = scalar_lea.sflag [#allocation4], %s2533_s23 }
  0x69   : > { %v2553_v2 = vld [vmem:[%s263_s13 + $0x20] sm:$0xff]  ;;  %v322_v3 = vadd.f32 %v2551_v1, %v2549_v0  ;;  %v2557_v4 = vld [vmem:[%s263_s13 + $0x28] sm:$0xff]  ;;  %v2559_v5 = vld [vmem:[%s263_s13 + $0x10] sm:$0xff]  ;;  %s1844_s7 = smul.u32 48, %s2315_s21  ;;  %s2341_s14 = smov [#allocation10]  }
  0x6a   : > { %v2561_v6 = vld [vmem:[%s263_s13 + $0x18] sm:$0xff]  ;;  %v328_v7 = vadd.f32 %v2557_v4, %v2553_v2  ;;  %v2565_v8 = vld [vmem:[%s263_s13 + $0x30] sm:$0xff]  ;;  %v2573_v12 = vld [vmem:[%s263_s13 + $0x40] sm:$0xff]  ;;  %s2806_s6 = scalar_lea.vmem [#allocation10], %s1843_s30  ;;  %s1845_s29 = smul.u32 96, %s2319_s22 }
  0x6b   : > { %v2567_v9 = vld [vmem:[%s263_s13 + $0x38] sm:$0xff]  ;;  %323 = vadd.xlane.f32.xlu0 %v322_v3  ;;  %v325_v10 = vadd.f32 %v2561_v6, %v2559_v5  ;;  %v2575_v13 = vld [vmem:[%s263_s13 + $0x48] sm:$0xff]  ;;  %v2577_v14 = vld [vmem:[%s263_s13 + $0x50] sm:$0xff]  ;;  %s1525_s22 = sshll.u32 %s2806_s6, 4  ;;  %s2231_s9 = sshll.u32 %s2341_s14, 4  ;;  %s2865_s22 = int_to_ptr.vmem [resolvable:$true] %s1525_s22  ;;  %s2232_s9 = int_to_ptr.vmem [resolvable:$false] %s2231_s9 }
  0x6c   : > { %329 = vadd.xlane.f32.xlu1 %v328_v7  ;;  %v331_v11 = vadd.f32 %v2567_v9, %v2565_v8  ;;  %v2579_v15 = vld [vmem:[%s263_s13 + $0x58] sm:$0xff]  ;;  %v2581_v16 = vld [vmem:[%s263_s13 + $0x60] sm:$0xff]  ;;  %v2583_v17 = vld [vmem:[%s263_s13 + $0x68] sm:$0xff]  ;;  %v334_v18 = vadd.f32 %v2575_v13, %v2573_v12  ;;  %s1522_s21 = sadd.s32 %s1845_s29, %s1844_s7  ;;  %s2227_s3 = scalar_lea.vmem %s2865_s22, 3072 }
  0x6d   : > { %v2587_v19 = vld [vmem:[%s263_s13 + $0x70] sm:$0xff]  ;;  %v2589_v20 = vld [vmem:[%s263_s13 + $0x78] sm:$0xff]  ;;  %v337_v21 = vadd.f32 %v2579_v15, %v2577_v14  ;;  %v340_v22 = vadd.f32 %v2583_v17, %v2581_v16  ;;  %v1967_v28 = vld [vmem:[#allocation8 + $0x124] ss:$24 sps:$4 sm:$0xff]   ;;  %s1783_s15 = sshll.u32 %s1522_s21, 6  ;;  %p2228_p1 = scmp.ne.s32.totalorder %s2865_s22, %s2227_s3 }
  0x6e   : > { %v343_v23 = vadd.f32 %v2589_v20, %v2587_v19  ;;  %v1961_v24 = vld [vmem:[#allocation8 + $0x154] ss:$24 sps:$4 sm:$0xff]   ;;  %v1965_v26 = vld [vmem:[#allocation8 + $0x150] ss:$24 sps:$4 sm:$0xff]   ;;  %v1971_v30 = vld [vmem:[#allocation8 + $0x120] ss:$24 sps:$4 sm:$0xff]   ;;  %s2870_s11 = scalar_lea.hbm %s2930_s5, %s1783_s15  ;;  %p2234_p4 = scmp.lt.s32.totalorder %s2865_s22, %s2232_s9 }
  0x6f   : > { %326 = vadd.xlane.f32.xlu0 %v325_v10  ;;  %v1963_v25 = vld [vmem:[#allocation8 + $0x15c] ss:$24 sps:$4 sm:$0xff]   ;;  %v1966_v27 = vld [vmem:[#allocation8 + $0x158] ss:$24 sps:$4 sm:$0xff]   ;;  %v1969_v29 = vld [vmem:[#allocation8 + $0x12c] ss:$24 sps:$4 sm:$0xff]   ;;  %1121 = vmatprep.subr.bf16.mxu0 %v1961_v24  ;;  %p2229_p6 = pnand %p2228_p1, %p2496_p13 }
  0x70   : > { %332 = vadd.xlane.f32.xlu1 %v331_v11  ;;  %1194 = vmatprep.subr.bf16.mxu1 %v1963_v25  ;;  %v1972_v31 = vld [vmem:[#allocation8 + $0x128] ss:$24 sps:$4 sm:$0xff]   ;;  %v1973_v32 = vld [vmem:[#allocation8 + $0xf4] ss:$24 sps:$4 sm:$0xff]   ;;  %v1978_v35 = vld [vmem:[#allocation8 + $0xf8] ss:$24 sps:$4 sm:$0xff]  }
  0x71   : > { %1122 = vmatpush1.bf16.msra.mxu0 %v1965_v26  ;;  %1195 = vmatpush1.bf16.msra.mxu1 %v1966_v27  ;;  %v1975_v33 = vld [vmem:[#allocation8 + $0xfc] ss:$24 sps:$4 sm:$0xff]   ;;  %v1977_v34 = vld [vmem:[#allocation8 + $0xf0] ss:$24 sps:$4 sm:$0xff]   ;;  %v1981_v37 = vld [vmem:[#allocation8 + $0xcc] ss:$24 sps:$4 sm:$0xff]   ;;  %p2230_p3 = pneg %p2229_p6 }
  0x72   : > { %1123 = vmatprep.subr.bf16.mxu0 %v1967_v28  ;;  %1196 = vmatprep.subr.bf16.mxu1 %v1969_v29  ;;  %v1979_v36 = vld [vmem:[#allocation8 + $0xc4] ss:$24 sps:$4 sm:$0xff]   ;;  %v1983_v38 = vld [vmem:[#allocation8 + $0xc0] ss:$24 sps:$4 sm:$0xff]   ;;  %v1985_v40 = vld [vmem:[#allocation8 + $0x94] ss:$24 sps:$4 sm:$0xff]  }
  0x73   : > { %335 = vadd.xlane.f32.xlu0 %v334_v18  ;;  %v1984_v39 = vld [vmem:[#allocation8 + $0xc8] ss:$24 sps:$4 sm:$0xff]   ;;  %v1987_v41 = vld [vmem:[#allocation8 + $0x9c] ss:$24 sps:$4 sm:$0xff]   ;;  %v1990_v43 = vld [vmem:[#allocation8 + $0x98] ss:$24 sps:$4 sm:$0xff]  }
  0x74   : > { %338 = vadd.xlane.f32.xlu1 %v337_v21  ;;  %v1989_v42 = vld [vmem:[#allocation8 + $0x90] ss:$24 sps:$4 sm:$0xff]   ;;  %v1991_v44 = vld [vmem:[#allocation8 + $0x64] ss:$24 sps:$4 sm:$0xff]   ;;  %v1995_v46 = vld [vmem:[#allocation8 + $0x60] ss:$24 sps:$4 sm:$0xff]  }
  0x75   : > { %1124 = vmatpush1.bf16.msra.mxu0 %v1971_v30  ;;  %1197 = vmatpush1.bf16.msra.mxu1 %v1972_v31  ;;  %v1993_v45 = vld [vmem:[#allocation8 + $0x6c] ss:$24 sps:$4 sm:$0xff]   ;;  %v1996_v47 = vld [vmem:[#allocation8 + $0x68] ss:$24 sps:$4 sm:$0xff]   ;;  %v1999_v49 = vld [vmem:[#allocation8 + $0x3c] ss:$24 sps:$4 sm:$0xff]  }
  0x76   : > { %1125 = vmatprep.subr.bf16.mxu0 %v1973_v32  ;;  %1198 = vmatprep.subr.bf16.mxu1 %v1975_v33  ;;  %v1997_v48 = vld [vmem:[#allocation8 + $0x34] ss:$24 sps:$4 sm:$0xff]   ;;  %v2001_v50 = vld [vmem:[#allocation8 + $0x30] ss:$24 sps:$4 sm:$0xff]   ;;  %v2003_v52 = vld [vmem:[#allocation8 + $0x4] ss:$24 sps:$4 sm:$0xff]  }
  0x77   : > { %341 = vadd.xlane.f32.xlu0 %v340_v22  ;;  %v2002_v51 = vld [vmem:[#allocation8 + $0x38] ss:$24 sps:$4 sm:$0xff]   ;;  %v2005_v53 = vld [vmem:[#allocation8 + $0xc] ss:$24 sps:$4 sm:$0xff]   ;;  %v2008_v55 = vld [vmem:[#allocation8 + $0x8] ss:$24 sps:$4 sm:$0xff]  }
  0x78   : > { %344 = vadd.xlane.f32.xlu1 %v343_v23  ;;  %v2007_v54 = vld [vmem:[#allocation8] ss:$24 sps:$4 sm:$0xff]   ;;  %v2009_v56 = vld [vmem:[#allocation8 + $0x2d4] ss:$24 sps:$4 sm:$0xff]   ;;  %v2013_v58 = vld [vmem:[#allocation8 + $0x2d0] ss:$24 sps:$4 sm:$0xff]  }
  0x79   : > { %1126 = vmatpush1.bf16.msra.mxu0 %v1977_v34  ;;  %1199 = vmatpush1.bf16.msra.mxu1 %v1978_v35  ;;  %v2011_v57 = vld [vmem:[#allocation8 + $0x2dc] ss:$24 sps:$4 sm:$0xff]   ;;  %v2014_v59 = vld [vmem:[#allocation8 + $0x2d8] ss:$24 sps:$4 sm:$0xff]   ;;  %s2233_s18 = scalar_lea.vmem %s2232_s9, 6144 }
  0x7a   : > { %1127 = vmatprep.subr.bf16.mxu0 %v1979_v36  ;;  %1200 = vmatprep.subr.bf16.mxu1 %v1981_v37  ;;  %p2235_p2 = scmp.lt.s32.totalorder %s2233_s18, %s2227_s3 }
  0x7c   : > { %p2236_p8 = por %p2235_p2, %p2234_p4 }
  0x7d   : > { %1128 = vmatpush1.bf16.msra.mxu0 %v1983_v38  ;;  %1201 = vmatpush1.bf16.msra.mxu1 %v1984_v39 }
  0x7e   : > { %1129 = vmatprep.subr.bf16.mxu0 %v1985_v40  ;;  %1202 = vmatprep.subr.bf16.mxu1 %v1987_v41  ;;  %p2237_p11 = pnand %p2236_p8, %p2230_p3 }
  0x81   : > { %1130 = vmatpush1.bf16.msra.mxu0 %v1989_v42  ;;  %1203 = vmatpush1.bf16.msra.mxu1 %v1990_v43 }
  0x82   : > { %1131 = vmatprep.subr.bf16.mxu0 %v1991_v44  ;;  %1204 = vmatprep.subr.bf16.mxu1 %v1993_v45 }
  0x85   : > { %1132 = vmatpush1.bf16.msra.mxu0 %v1995_v46  ;;  %1205 = vmatpush1.bf16.msra.mxu1 %v1996_v47 }
  0x86   : > { %1133 = vmatprep.subr.bf16.mxu0 %v1997_v48  ;;  %1206 = vmatprep.subr.bf16.mxu1 %v1999_v49 }
  0x89   : > { %1134 = vmatpush1.bf16.msra.mxu0 %v2001_v50  ;;  %1207 = vmatpush1.bf16.msra.mxu1 %v2002_v51 }
  0x8a   : > { %1135 = vmatprep.subr.bf16.mxu0 %v2003_v52  ;;  %1208 = vmatprep.subr.bf16.mxu1 %v2005_v53  ;;  %v2015_v52 = vld [vmem:[#allocation8 + $0x2a4] ss:$24 sps:$4 sm:$0xff]  }
  0x8b   : > { %v2017_v53 = vld [vmem:[#allocation8 + $0x2ac] ss:$24 sps:$4 sm:$0xff]  }
  0x8d   : > { %1136 = vmatpush1.bf16.msra.mxu0 %v2007_v54  ;;  %1209 = vmatpush1.bf16.msra.mxu1 %v2008_v55  ;;  %v2020_v54 = vld [vmem:[#allocation8 + $0x2a8] ss:$24 sps:$4 sm:$0xff]  }
  0x8e   : > { %1137 = vmatprep.subr.bf16.mxu0 %v2009_v56  ;;  %1210 = vmatprep.subr.bf16.mxu1 %v2011_v57  ;;  %v2021_v56 = vld [vmem:[#allocation8 + $0x274] ss:$24 sps:$4 sm:$0xff]  }
  0x8f   : > { %v2023_v57 = vld [vmem:[#allocation8 + $0x27c] ss:$24 sps:$4 sm:$0xff]  }
  0x91   : > { %1138 = vmatpush2.bf16.msra.mxu0 %v2013_v58  ;;  %1211 = vmatpush2.bf16.msra.mxu1 %v2014_v59  ;;  %v2025_v58 = vld [vmem:[#allocation8 + $0x270] ss:$24 sps:$4 sm:$0xff]  }
  0x92   : > { %1139 = vmatprep.subr.bf16.mxu0 %v2015_v52  ;;  %1212 = vmatprep.subr.bf16.mxu1 %v2017_v53  ;;  %v2026_v59 = vld [vmem:[#allocation8 + $0x278] ss:$24 sps:$4 sm:$0xff]  }
  0x95   : > { %1213 = vmatpush2.bf16.msra.mxu1 %v2020_v54 }
  0x96   : > { %1214 = vmatprep.subr.bf16.mxu1 %v2023_v57  ;;  %v320_v57 = vld [vmem:[#allocation5] sm:$0x3] }
  0x99   : > { %1215 = vmatpush2.bf16.msra.mxu1 %v2026_v59 }
  0xf4   : > { %v324_v60 = vpop.xlane.xlu0 %323 }
  0xf5   : > { %v347_v61 = vmul.f32 0.00390625, %v324_v60  ;;  %v330_v62 = vpop.xlane.xlu1 %329  ;;  %v2027_v60 = vld [vmem:[#allocation8 + $0x244] ss:$24 sps:$4 sm:$0xff]  }
  0xf6   : > { %v349_v63 = vmul.f32 0.00390625, %v330_v62  ;;  %v2031_v62 = vld [vmem:[#allocation8 + $0x240] ss:$24 sps:$4 sm:$0xff]  }
  0xf7   : > { %v2598_v3 = vsub.f32 %v2549_v0, %v347_v61  ;;  %v2601_v7 = vsub.f32 %v2551_v1, %v347_v61  ;;  %v2029_v61 = vld [vmem:[#allocation8 + $0x24c] ss:$24 sps:$4 sm:$0xff]  }
  0xf8   : > { %v2604_v10 = vsub.f32 %v2553_v2, %v349_v63  ;;  %v2607_v11 = vsub.f32 %v2557_v4, %v349_v63  ;;  %v327_v18 = vpop.xlane.xlu0 %326  ;;  %v2032_v63 = vld [vmem:[#allocation8 + $0x248] ss:$24 sps:$4 sm:$0xff]   ;;  %1216 = vmatprep.subr.bf16.mxu1 %v2029_v61 }
  0xf9   : > { %v348_v21 = vmul.f32 0.00390625, %v327_v18  ;;  %v333_v22 = vpop.xlane.xlu1 %332  ;;  %v371_v23 = vmul.f32 %v2598_v3, %v2598_v3  ;;  %v372_v24 = vmul.f32 %v2601_v7, %v2601_v7  ;;  %1217 = vmatpush2.bf16.msra.mxu1 %v2032_v63  ;;  %v2033_v18 = vld [vmem:[#allocation8 + $0x214] ss:$24 sps:$4 sm:$0xff]  }
  0xfa   : > { %v350_v0 = vmul.f32 0.00390625, %v333_v22  ;;  %v375_v1 = vmul.f32 %v2604_v10, %v2604_v10  ;;  %v376_v2 = vmul.f32 %v2607_v11, %v2607_v11  ;;  %v2037_v22 = vld [vmem:[#allocation8 + $0x210] ss:$24 sps:$4 sm:$0xff]  }
  0xfb   : > { %v2618_v25 = vsub.f32 %v2559_v5, %v348_v21  ;;  %v2621_v4 = vsub.f32 %v2561_v6, %v348_v21  ;;  %v387_v26 = vadd.f32 %v372_v24, %v371_v23  ;;  %v2035_v21 = vld [vmem:[#allocation8 + $0x21c] ss:$24 sps:$4 sm:$0xff]   ;;  %v2038_v23 = vld [vmem:[#allocation8 + $0x218] ss:$24 sps:$4 sm:$0xff]  }
  0xfc   : > { %v2624_v27 = vsub.f32 %v2565_v8, %v350_v0  ;;  %v2627_v28 = vsub.f32 %v2567_v9, %v350_v0  ;;  %v336_v29 = vpop.xlane.xlu0 %335  ;;  %v393_v32 = vadd.f32 %v376_v2, %v375_v1  ;;  %1218 = vmatprep.subr.bf16.mxu1 %v2035_v21  ;;  %v2039_v24 = vld [vmem:[#allocation8 + $0x1e4] ss:$24 sps:$4 sm:$0xff]   ;;  %v2043_v1 = vld [vmem:[#allocation8 + $0x1e0] ss:$24 sps:$4 sm:$0xff]  }
  0xfd   : > { %v351_v30 = vmul.f32 0.00390625, %v336_v29  ;;  %388 = vadd.xlane.f32.xlu0 %v387_v26  ;;  %v339_v31 = vpop.xlane.xlu1 %338  ;;  %v373_v33 = vmul.f32 %v2618_v25, %v2618_v25  ;;  %v374_v5 = vmul.f32 %v2621_v4, %v2621_v4  ;;  %1219 = vmatpush2.bf16.msra.mxu1 %v2038_v23  ;;  %v2041_v0 = vld [vmem:[#allocation8 + $0x1ec] ss:$24 sps:$4 sm:$0xff]   ;;  %v2044_v2 = vld [vmem:[#allocation8 + $0x1e8] ss:$24 sps:$4 sm:$0xff]  }
  0xfe   : > { %v352_v6 = vmul.f32 0.00390625, %v339_v31  ;;  %v377_v34 = vmul.f32 %v2624_v27, %v2624_v27  ;;  %v378_v8 = vmul.f32 %v2627_v28, %v2627_v28  ;;  %1220 = vmatprep.subr.bf16.mxu1 %v2041_v0  ;;  %v2045_v26 = vld [vmem:[#allocation8 + $0x1b4] ss:$24 sps:$4 sm:$0xff]   ;;  %v2050_v31 = vld [vmem:[#allocation8 + $0x1b8] ss:$24 sps:$4 sm:$0xff]  }
  0xff   : > { %v2638_v9 = vsub.f32 %v2573_v12, %v351_v30  ;;  %v2641_v35 = vsub.f32 %v2575_v13, %v351_v30  ;;  %v390_v36 = vadd.f32 %v374_v5, %v373_v33  ;;  %v2047_v29 = vld [vmem:[#allocation8 + $0x1bc] ss:$24 sps:$4 sm:$0xff]   ;;  %v2049_v30 = vld [vmem:[#allocation8 + $0x1b0] ss:$24 sps:$4 sm:$0xff]   ;;  %v2053_v33 = vld [vmem:[#allocation8 + $0x18c] ss:$24 sps:$4 sm:$0xff]  }
 0x100   : > { %v2644_v37 = vsub.f32 %v2577_v14, %v352_v6  ;;  %v2647_v38 = vsub.f32 %v2579_v15, %v352_v6  ;;  %v342_v39 = vpop.xlane.xlu0 %341  ;;  %v396_v42 = vadd.f32 %v378_v8, %v377_v34  ;;  %v2055_v5 = vld [vmem:[#allocation8 + $0x180] ss:$24 sps:$4 sm:$0xff]   ;;  %v2059_v34 = vld [vmem:[#allocation8 + $0x164] ss:$24 sps:$4 sm:$0xff]  }
 0x101   : > { %v353_v40 = vmul.f32 0.00390625, %v342_v39  ;;  %394 = vadd.xlane.f32.xlu0 %v393_v32  ;;  %391 = vadd.xlane.f32.xlu1 %v390_v36  ;;  %v345_v41 = vpop.xlane.xlu1 %344  ;;  %v379_v12 = vmul.f32 %v2638_v9, %v2638_v9  ;;  %v380_v13 = vmul.f32 %v2641_v35, %v2641_v35  ;;  %v2051_v32 = vld [vmem:[#allocation8 + $0x184] ss:$24 sps:$4 sm:$0xff]   ;;  %v2056_v6 = vld [vmem:[#allocation8 + $0x188] ss:$24 sps:$4 sm:$0xff]  }
 0x102   : > { %v354_v43 = vmul.f32 0.00390625, %v345_v41  ;;  %v381_v14 = vmul.f32 %v2644_v37, %v2644_v37  ;;  %v382_v15 = vmul.f32 %v2647_v38, %v2647_v38  ;;  %1221 = vmatpush2.bf16.msra.mxu1 %v2044_v2 }
 0x103   : > { %v2658_v44 = vsub.f32 %v2581_v16, %v353_v40  ;;  %v2661_v45 = vsub.f32 %v2583_v17, %v353_v40  ;;  %v399_v46 = vadd.f32 %v380_v13, %v379_v12  ;;  %1222 = vmatprep.subr.bf16.mxu1 %v2047_v29  ;;  %v452_v13 = vlaneseq }
 0x104   : > { %v2664_v47 = vsub.f32 %v2587_v19, %v354_v43  ;;  %v2667_v48 = vsub.f32 %v2589_v20, %v354_v43  ;;  %v402_v49 = vadd.f32 %v382_v15, %v381_v14  ;;  %v2019_v20 = vld [vmem:[#allocation8 + $0x2a0] ss:$24 sps:$4 sm:$0xff]  }
 0x105   : > { %397 = vadd.xlane.f32.xlu1 %v396_v42  ;;  %400 = vadd.xlane.f32.xlu0 %v399_v46  ;;  %v383_v50 = vmul.f32 %v2658_v44, %v2658_v44  ;;  %v384_v16 = vmul.f32 %v2661_v45, %v2661_v45 }
 0x106   : > { %v385_v17 = vmul.f32 %v2664_v47, %v2664_v47  ;;  %v386_v51 = vmul.f32 %v2667_v48, %v2667_v48  ;;  %1140 = vmatpush2.bf16.msra.mxu0 %v2019_v20  ;;  %1223 = vmatpush2.bf16.msra.mxu1 %v2050_v31 }
 0x107   : > { %v405_v19 = vadd.f32 %v384_v16, %v383_v50  ;;  %1141 = vmatprep.subr.bf16.mxu0 %v2021_v56  ;;  %1224 = vmatprep.subr.bf16.mxu1 %v2053_v33  ;;  %v2677_v16 = vshrl.u32 %v452_v13, 7 }
 0x108   : > { %v408_v55 = vadd.f32 %v386_v51, %v385_v17 }
 0x109   : > { %403 = vadd.xlane.f32.xlu1 %v402_v49  ;;  %406 = vadd.xlane.f32.xlu0 %v405_v19  ;;  %v2680_v54 = vsub.s32 1, %v2677_v16 }
 0x10a   : > { %1142 = vmatpush2.bf16.msra.mxu0 %v2025_v58  ;;  %1225 = vmatpush2.bf16.msra.mxu1 %v2056_v6 }
 0x10b   : > { %1143 = vmatprep.subr.bf16.mxu0 %v2027_v60  ;;  %1811 = vmatprep.subr.bf16.mxu1 %v2059_v34  ;;  %v2686_v63 = vrot.slane %v320_v57, %v2680_v54 }
 0x10d   : > { %409 = vadd.xlane.f32.xlu1 %v408_v55  ;;  %v2683_v55 = vsub.s32 0, %v2677_v16 }
 0x10e   : > { %1144 = vmatpush2.bf16.msra.mxu0 %v2031_v62  ;;  %v321_v62 = vld [vmem:[#allocation7] sm:$0x3] }
 0x10f   : > { %1145 = vmatprep.subr.bf16.mxu0 %v2033_v18  ;;  %v2689_v18 = vrot.slane %v320_v57, %v2683_v55 }
 0x112   : > { %1146 = vmatpush2.bf16.msra.mxu0 %v2037_v22 }
 0x113   : > { %1147 = vmatprep.subr.bf16.mxu0 %v2039_v24  ;;  %v2694_v24 = vrot.slane %v321_v62, %v2680_v54 }
 0x116   : > { %1148 = vmatpush2.bf16.msra.mxu0 %v2043_v1 }
 0x117   : > { %1149 = vmatprep.subr.bf16.mxu0 %v2045_v26  ;;  %v2699_v26 = vrot.slane %v321_v62, %v2683_v55 }
 0x11a   : > { %1150 = vmatpush2.bf16.msra.mxu0 %v2049_v30 }
 0x11b   : > { %1151 = vmatprep.subr.bf16.mxu0 %v2051_v32 }
 0x11e   : > { %1152 = vmatpush2.bf16.msra.mxu0 %v2055_v5 }
 0x11f   : > { %1267 = vmatprep.subr.bf16.mxu0 %v2059_v34 }
 0x186   : > { %v389_v8 = vpop.xlane.xlu0 %388 }
 0x187   : > { %v411_v36 = vmul.f32 0.00390625, %v389_v8 }
 0x189   : > { %v419_v39 = vadd.f32 1e-05, %v411_v36 }
 0x18a   : > { %v392_v40 = vpop.xlane.xlu1 %391  ;;  %v395_v41 = vpop.xlane.xlu0 %394 }
 0x18b   : > { %2105 = vrsqrt.f32 %v419_v39  ;;  %v412_v42 = vmul.f32 0.00390625, %v392_v40  ;;  %v413_v12 = vmul.f32 0.00390625, %v395_v41  ;;  %v2057_v41 = vld [vmem:[#allocation8 + $0x160] ss:$24 sps:$4 sm:$0xff]  }
 0x18d   : > { %v420_v43 = vadd.f32 1e-05, %v412_v42  ;;  %v421_v14 = vadd.f32 1e-05, %v413_v12 }
 0x18e   : > { %v398_v15 = vpop.xlane.xlu1 %397  ;;  %v401_v46 = vpop.xlane.xlu0 %400 }
 0x18f   : > { %2107 = vrsqrt.f32 %v420_v43  ;;  %v414_v49 = vmul.f32 0.00390625, %v398_v15  ;;  %v415_v50 = vmul.f32 0.00390625, %v401_v46 }
 0x190   : > { %2109 = vrsqrt.f32 %v421_v14  ;;  %v2062_v14 = vld [vmem:[#allocation8 + $0x134] ss:$24 sps:$4 sm:$0xff]  }
 0x191   : > { %v422_v17 = vadd.f32 1e-05, %v414_v49  ;;  %v423_v51 = vadd.f32 1e-05, %v415_v50  ;;  %v2060_v49 = vld [vmem:[#allocation8 + $0x130] ss:$24 sps:$4 sm:$0xff]  }
 0x192   : > { %v404_v19 = vpop.xlane.xlu1 %403  ;;  %v407_v52 = vpop.xlane.xlu0 %406 }
 0x193   : > { %2111 = vrsqrt.f32 %v422_v17  ;;  %v416_v53 = vmul.f32 0.00390625, %v404_v19  ;;  %v417_v20 = vmul.f32 0.00390625, %v407_v52  ;;  %v2065_v19 = vld [vmem:[#allocation8 + $0x104] ss:$24 sps:$4 sm:$0xff]  }
 0x194   : > { %2113 = vrsqrt.f32 %v423_v51 }
 0x195   : > { %v424_v56 = vadd.f32 1e-05, %v416_v53  ;;  %v425_v61 = vadd.f32 1e-05, %v417_v20 }
 0x196   : > { %v410_v58 = vpop.xlane.xlu1 %409 }
 0x197   : > { %2115 = vrsqrt.f32 %v424_v56  ;;  %v418_v59 = vmul.f32 0.00390625, %v410_v58 }
 0x198   : > { %v2106_v60 = vpop.eup %2105 }
 0x199   : > { %v426_v21 = vadd.f32 1e-05, %v418_v59  ;;  %v436_v22 = vmul.f32 %v2106_v60, %v2601_v7  ;;  %v435_v23 = vmul.f32 %v2106_v60, %v2598_v3  ;;  %v2063_v59 = vld [vmem:[#allocation8 + $0x100] ss:$24 sps:$4 sm:$0xff]  }
 0x19b   : > { %2117 = vrsqrt.f32 %v426_v21  ;;  %v463_v1 = vmul.f32 %v2686_v63, %v436_v22  ;;  %v462_v2 = vmul.f32 %v2689_v18, %v435_v23  ;;  %v2068_v21 = vld [vmem:[#allocation8 + $0xd4] ss:$24 sps:$4 sm:$0xff]   ;;  %v2066_v23 = vld [vmem:[#allocation8 + $0xd0] ss:$24 sps:$4 sm:$0xff]  }
 0x19c   : > { %v2108_v0 = vpop.eup %2107  ;;  %2119 = vrsqrt.f32 %v425_v61 }
 0x19d   : > { %v2110_v29 = vpop.eup %2109  ;;  %v438_v30 = vmul.f32 %v2108_v0, %v2621_v4  ;;  %v437_v7 = vmul.f32 %v2108_v0, %v2618_v25  ;;  %v490_v5 = vadd.f32 %v2694_v24, %v463_v1  ;;  %v489_v6 = vadd.f32 %v2699_v26, %v462_v2  ;;  %v2071_v0 = vld [vmem:[#allocation8 + $0xa4] ss:$24 sps:$4 sm:$0xff]  }
 0x19e   : > { %v440_v3 = vmul.f32 %v2110_v29, %v2607_v11  ;;  %v439_v39 = vmul.f32 %v2110_v29, %v2604_v10 }
 0x19f   : > { %v465_v31 = vmul.f32 %v2686_v63, %v438_v30  ;;  %v464_v32 = vmul.f32 %v2689_v18, %v437_v7 }
 0x1a0   : > { %v2112_v33 = vpop.eup %2111  ;;  %v467_v34 = vmul.f32 %v2686_v63, %v440_v3  ;;  %v2069_v3 = vld [vmem:[#allocation8 + $0xa0] ss:$24 sps:$4 sm:$0xff]  }
 0x1a1   : > { %v2114_v8 = vpop.eup %2113  ;;  %v492_v36 = vadd.f32 %v2694_v24, %v465_v31  ;;  %v491_v4 = vadd.f32 %v2699_v26, %v464_v32  ;;  %v442_v25 = vmul.f32 %v2112_v33, %v2627_v28  ;;  %v441_v11 = vmul.f32 %v2112_v33, %v2624_v27 }
 0x1a2   : > { %v444_v13 = vmul.f32 %v2114_v8, %v2641_v35  ;;  %v494_v27 = vadd.f32 %v2694_v24, %v467_v34  ;;  %v466_v35 = vmul.f32 %v2689_v18, %v439_v39  ;;  %v443_v57 = vmul.f32 %v2114_v8, %v2638_v9  ;;  %v2075_v8 = vld [vmem:[#allocation8 + $0x40] ss:$24 sps:$4 sm:$0xff]   ;;  %v2084_v39 = vld [vmem:[#allocation8 + $0x2b0] ss:$24 sps:$4 sm:$0xff]  }
 0x1a3   : > { %v2714_v40 = vpack.c.bf16 %v492_v36, %v490_v5  ;;  %v2716_v42 = vpack.c.bf16 %v491_v4, %v489_v6  ;;  %v469_v12 = vmul.f32 %v2686_v63, %v442_v25  ;;  %v468_v15 = vmul.f32 %v2689_v18, %v441_v11  ;;  %v2072_v5 = vld [vmem:[#allocation8 + $0x70] ss:$24 sps:$4 sm:$0xff]   ;;  %v2077_v6 = vld [vmem:[#allocation8 + $0x44] ss:$24 sps:$4 sm:$0xff]   ;;  %v2080_v36 = vld [vmem:[#allocation8 + $0x14] ss:$24 sps:$4 sm:$0xff]  }
 0x1a4   : > { %v2116_v43 = vpop.eup %2115  ;;  %v471_v50 = vmul.f32 %v2686_v63, %v444_v13  ;;  %v493_v20 = vadd.f32 %v2699_v26, %v466_v35  ;;  %v2078_v4 = vld [vmem:[#allocation8 + $0x10] ss:$24 sps:$4 sm:$0xff]   ;;  %v2083_v25 = vld [vmem:[#allocation8 + $0x2e4] ss:$24 sps:$4 sm:$0xff]   ;;  %v2086_v11 = vld [vmem:[#allocation8 + $0x2b4] ss:$24 sps:$4 sm:$0xff]  }
 0x1a5   : > { %1153 = vmatprep.mubr.bf16.mxu0 %v2714_v40  ;;  %1226 = vmatprep.mubr.bf16.mxu1 %v2714_v40  ;;  %v496_v10 = vadd.f32 %v2694_v24, %v469_v12  ;;  %v446_v28 = vmul.f32 %v2116_v43, %v2647_v38  ;;  %v495_v38 = vadd.f32 %v2699_v26, %v468_v15  ;;  %v2087_v12 = vld [vmem:[#allocation8 + $0x280] ss:$24 sps:$4 sm:$0xff]   ;;  %v2090_v13 = vld [vmem:[#allocation8 + $0x250] ss:$24 sps:$4 sm:$0xff]   ;;  %v2098_v15 = vld [vmem:[#allocation8 + $0x1f4] ss:$24 sps:$4 sm:$0xff]  }
 0x1a6   : > { %1154 = vmatmul.mubr.bf16.vlgmr.msra.gmra.mxu0 %v2716_v42  ;;  %1227 = vmatmul.mubr.bf16.vlgmr.msra.gmra.mxu1 %v2716_v42  ;;  %v445_v52 = vmul.f32 %v2116_v43, %v2644_v37  ;;  %v498_v60 = vadd.f32 %v2694_v24, %v471_v50  ;;  %v2095_v43 = vld [vmem:[#allocation8 + $0x224] ss:$24 sps:$4 sm:$0xff]   ;;  %v2104_v35 = vld [vmem:[#allocation8 + $0x194] ss:$24 sps:$4 sm:$0xff]   ;;  %v621_v50 = vsub.s32 2, %v2677_v16 }
 0x1a7   : > { %1268 = vmatpush1.bf16.msra.mxu0 %v2057_v41  ;;  %1827 = vmatpush1.bf16.msra.mxu1 %v2057_v41  ;;  %v2729_v46 = vpack.c.bf16 %v496_v10, %v494_v27  ;;  %v473_v17 = vmul.f32 %v2686_v63, %v446_v28  ;;  %v2742_v37 = vpack.c.bf16 %v495_v38, %v493_v20  ;;  %v2089_v41 = vld [vmem:[#allocation8 + $0x284] ss:$24 sps:$4 sm:$0xff]   ;;  %v2096_v27 = vld [vmem:[#allocation8 + $0x1f0] ss:$24 sps:$4 sm:$0xff]   ;;  %v2099_v28 = vld [vmem:[#allocation8 + $0x1c0] ss:$24 sps:$4 sm:$0xff]  }
 0x1a8   : > { %v2118_v51 = vpop.eup %2117  ;;  %1269 = vmatprep.subr.bf16.mxu0 %v2062_v14  ;;  %1812 = vmatprep.subr.bf16.mxu1 %v2062_v14  ;;  %v472_v61 = vmul.f32 %v2689_v18, %v445_v52  ;;  %v2093_v14 = vld [vmem:[#allocation8 + $0x220] ss:$24 sps:$4 sm:$0xff]   ;;  %v2101_v10 = vld [vmem:[#allocation8 + $0x1c4] ss:$24 sps:$4 sm:$0xff]  }
 0x1a9   : > { %v2120_v53 = vpop.eup %2119  ;;  %1163 = vmatprep.mubr.bf16.mxu0 %v2729_v46  ;;  %1236 = vmatprep.mubr.bf16.mxu1 %v2729_v46  ;;  %v500_v56 = vadd.f32 %v2694_v24, %v473_v17  ;;  %v450_v58 = vmul.f32 %v2118_v51, %v2667_v48  ;;  %v470_v48 = vmul.f32 %v2689_v18, %v443_v57  ;;  %v625_v17 = vsub.s32 3, %v2677_v16 }
 0x1aa   : > { %v448_v62 = vmul.f32 %v2120_v53, %v2661_v45  ;;  %v499_v1 = vadd.f32 %v2699_v26, %v472_v61  ;;  %v449_v2 = vmul.f32 %v2118_v51, %v2664_v47  ;;  %v447_v7 = vmul.f32 %v2120_v53, %v2658_v44  ;;  %v2074_v47 = vld [vmem:[#allocation8 + $0x74] ss:$24 sps:$4 sm:$0xff]   ;;  %v2785_v51 = vld [vmem:[%s2929_s4] sm:$0x3f] }
 0x1ab   : > { %1270 = vmatpush1.bf16.msra.mxu0 %v2060_v49  ;;  %1828 = vmatpush1.bf16.msra.mxu1 %v2060_v49  ;;  %v510_v9 = vpack.c.bf16 %v500_v56, %v498_v60  ;;  %v477_v22 = vmul.f32 %v2686_v63, %v450_v58  ;;  %v497_v29 = vadd.f32 %v2699_v26, %v470_v48  ;;  %v2102_v49 = vld [vmem:[#allocation8 + $0x190] ss:$24 sps:$4 sm:$0xff]  }
 0x1ac   : > { %1271 = vmatprep.subr.bf16.mxu0 %v2065_v19  ;;  %1813 = vmatprep.subr.bf16.mxu1 %v2065_v19  ;;  %v475_v45 = vmul.f32 %v2686_v63, %v448_v62  ;;  %v476_v63 = vmul.f32 %v2689_v18, %v449_v2  ;;  %v474_v44 = vmul.f32 %v2689_v18, %v447_v7 }
 0x1ad   : > { %v504_v30 = vadd.f32 %v2694_v24, %v477_v22  ;;  %v2756_v31 = vpack.c.bf16 %v499_v1, %v497_v29  ;;  %v2796_v19 = vrot.slane %v2785_v51, %v2680_v54  ;;  %v2799_v38 = vrot.slane %v2785_v51, %v625_v17 }
 0x1ae   : > { %1164 = vmatmul.mubr.bf16.gmra.mxu0 %v2742_v37  ;;  %1237 = vmatmul.mubr.bf16.gmra.mxu1 %v2742_v37  ;;  %v502_v32 = vadd.f32 %v2694_v24, %v475_v45  ;;  %v503_v24 = vadd.f32 %v2699_v26, %v476_v63  ;;  %v501_v34 = vadd.f32 %v2699_v26, %v474_v44  ;;  %v2081_v26 = vld [vmem:[#allocation8 + $0x2e0] ss:$24 sps:$4 sm:$0xff]  }
 0x1af   : > { %1272 = vmatpush1.bf16.msra.mxu0 %v2063_v59  ;;  %1829 = vmatpush1.bf16.msra.mxu1 %v2063_v59 }
 0x1b0   : > { %1173 = vmatprep.mubr.bf16.mxu0 %v510_v9  ;;  %1246 = vmatprep.mubr.bf16.mxu1 %v510_v9  ;;  %v2762_v33 = vpack.c.bf16 %v504_v30, %v502_v32  ;;  %v2769_v18 = vpack.c.bf16 %v503_v24, %v501_v34 }
 0x1b1   : > { %1273 = vmatprep.subr.bf16.mxu0 %v2068_v21  ;;  %1814 = vmatprep.subr.bf16.mxu1 %v2068_v21 }
 0x1b3   : > { %1274 = vmatpush1.bf16.msra.mxu0 %v2066_v23  ;;  %1830 = vmatpush1.bf16.msra.mxu1 %v2066_v23 }
 0x1b4   : > { %1275 = vmatprep.subr.bf16.mxu0 %v2071_v0  ;;  %1815 = vmatprep.subr.bf16.mxu1 %v2071_v0 }
 0x1b6   : > { %1174 = vmatmul.mubr.bf16.gmra.mxu0 %v2756_v31  ;;  %1247 = vmatmul.mubr.bf16.gmra.mxu1 %v2756_v31 }
 0x1b7   : > { %1276 = vmatpush1.bf16.msra.mxu0 %v2069_v3  ;;  %1831 = vmatpush1.bf16.msra.mxu1 %v2069_v3 }
 0x1b8   : > { %1183 = vmatprep.mubr.bf16.mxu0 %v2762_v33  ;;  %1256 = vmatprep.mubr.bf16.mxu1 %v2762_v33 }
 0x1b9   : > { %1277 = vmatprep.subr.bf16.mxu0 %v2074_v47  ;;  %1816 = vmatprep.subr.bf16.mxu1 %v2074_v47 }
 0x1bb   : > { %1278 = vmatpush1.bf16.msra.mxu0 %v2072_v5  ;;  %1832 = vmatpush1.bf16.msra.mxu1 %v2072_v5 }
 0x1bc   : > { %1279 = vmatprep.subr.bf16.mxu0 %v2077_v6  ;;  %1817 = vmatprep.subr.bf16.mxu1 %v2077_v6 }
 0x1be   : > { %1184 = vmatmul.mubr.bf16.gmra.mxu0 %v2769_v18  ;;  %1257 = vmatmul.mubr.bf16.gmra.mxu1 %v2769_v18 }
 0x1bf   : > { %1280 = vmatpush1.bf16.msra.mxu0 %v2075_v8  ;;  %1833 = vmatpush1.bf16.msra.mxu1 %v2075_v8 }
 0x1c0   : > { %1299 = vmatprep.mubr.bf16.mxu0 %v2714_v40  ;;  %1319 = vmatprep.mubr.bf16.mxu1 %v510_v9  ;;  %v2092_v40 = vld [vmem:[#allocation8 + $0x254] ss:$24 sps:$4 sm:$0xff]  }
 0x1c1   : > { %1281 = vmatprep.subr.bf16.mxu0 %v2080_v36  ;;  %1818 = vmatprep.subr.bf16.mxu1 %v2080_v36 }
 0x1c3   : > { %1282 = vmatpush1.bf16.msra.mxu0 %v2078_v4  ;;  %1834 = vmatpush1.bf16.msra.mxu1 %v2078_v4 }
 0x1c4   : > { %1283 = vmatprep.subr.bf16.mxu0 %v2083_v25  ;;  %1819 = vmatprep.subr.bf16.mxu1 %v2083_v25 }
 0x1c7   : > { %1284 = vmatpush2.bf16.msra.mxu0 %v2081_v26  ;;  %1835 = vmatpush2.bf16.msra.mxu1 %v2081_v26 }
 0x1c8   : > { %1285 = vmatprep.subr.bf16.mxu0 %v2086_v11  ;;  %1820 = vmatprep.subr.bf16.mxu1 %v2086_v11 }
 0x1cb   : > { %1286 = vmatpush2.bf16.msra.mxu0 %v2084_v39  ;;  %1836 = vmatpush2.bf16.msra.mxu1 %v2084_v39 }
 0x1cc   : > { %1287 = vmatprep.subr.bf16.mxu0 %v2089_v41  ;;  %1821 = vmatprep.subr.bf16.mxu1 %v2089_v41 }
 0x1cf   : > { %1288 = vmatpush2.bf16.msra.mxu0 %v2087_v12  ;;  %1837 = vmatpush2.bf16.msra.mxu1 %v2087_v12 }
 0x1d0   : > { %1289 = vmatprep.subr.bf16.mxu0 %v2092_v40  ;;  %1822 = vmatprep.subr.bf16.mxu1 %v2092_v40 }
 0x1d3   : > { %1290 = vmatpush2.bf16.msra.mxu0 %v2090_v13  ;;  %1838 = vmatpush2.bf16.msra.mxu1 %v2090_v13 }
 0x1d4   : > { %1291 = vmatprep.subr.bf16.mxu0 %v2095_v43  ;;  %1823 = vmatprep.subr.bf16.mxu1 %v2095_v43 }
 0x1d7   : > { %1292 = vmatpush2.bf16.msra.mxu0 %v2093_v14  ;;  %1839 = vmatpush2.bf16.msra.mxu1 %v2093_v14 }
 0x1d8   : > { %1293 = vmatprep.subr.bf16.mxu0 %v2098_v15  ;;  %1824 = vmatprep.subr.bf16.mxu1 %v2098_v15 }
 0x1db   : > { %1294 = vmatpush2.bf16.msra.mxu0 %v2096_v27  ;;  %1840 = vmatpush2.bf16.msra.mxu1 %v2096_v27 }
 0x1dc   : > { %1295 = vmatprep.subr.bf16.mxu0 %v2101_v10  ;;  %1825 = vmatprep.subr.bf16.mxu1 %v2101_v10 }
 0x1df   : > { %1296 = vmatpush2.bf16.msra.mxu0 %v2099_v28  ;;  %1841 = vmatpush2.bf16.msra.mxu1 %v2099_v28 }
 0x1e0   : > { %1297 = vmatprep.subr.bf16.mxu0 %v2104_v35  ;;  %1826 = vmatprep.subr.bf16.mxu1 %v2104_v35 }
 0x1e3   : > { %1298 = vmatpush2.bf16.msra.mxu0 %v2102_v49  ;;  %1842 = vmatpush2.bf16.msra.mxu1 %v2102_v49 }
 0x1e6   : > { %1300 = vmatmul.mubr.bf16.vlgmr.msra.gmra.mxu0 %v2716_v42  ;;  %1320 = vmatmul.mubr.bf16.vlgmr.msra.gmra.mxu1 %v2756_v31  ;;  %v2789_v42 = vrot.slane %v2785_v51, %v2683_v55 }
 0x1e7   : > { %1309 = vmatprep.mubr.bf16.mxu0 %v2729_v46  ;;  %1329 = vmatprep.mubr.bf16.mxu1 %v2762_v33  ;;  %v2792_v46 = vrot.slane %v2785_v51, %v621_v50 }
 0x1ee   : > { %1310 = vmatmul.mubr.bf16.gmra.mxu0 %v2742_v37  ;;  %1330 = vmatmul.mubr.bf16.gmra.mxu1 %v2769_v18 }
 0x266   : > { %v1155_v52 = vpop.f32.mrf.mxu0  ;;  %v1228_v53 = vpop.f32.mrf.mxu1 }
 0x267   : > { %v1156_v57 = vadd.f32 %v1155_v52, %v2789_v42  ;;  %v1229_v55 = vadd.f32 %v1228_v53, %v2792_v46 }
 0x268   : > { %v1157_v20 = vpop.f32.mrf.mxu0  ;;  %v1230_v56 = vpop.f32.mrf.mxu1 }
 0x269   : > { %v1158_v58 = vadd.f32 %v1157_v20, %v2796_v19  ;;  %v1231_v59 = vadd.f32 %v1230_v56, %v2799_v38 }
 0x26a   : > { %v1159_v60 = vpop.f32.mrf.mxu0  ;;  %v1232_v37 = vpop.f32.mrf.mxu1 }
 0x26b   : > { %v1787_v54 = vpack.c.bf16 %v1158_v58, %v1156_v57  ;;  %v1788_v61 = vpack.c.bf16 %v1231_v59, %v1229_v55  ;;  %v1160_v9 = vadd.f32 %v1159_v60, %v2789_v42  ;;  %v1233_v48 = vadd.f32 %v1232_v37, %v2792_v46 }
 0x26c   : > { %v1161_v62 = vpop.f32.mrf.mxu0  ;;  %v1234_v21 = vpop.f32.mrf.mxu1 }
 0x26d   : > { %1484 = vst [vmem:[%s2806_s6] sm:$0xff] %v1787_v54  ;;  %1485 = vst [vmem:[%s2806_s6 + $0x8] sm:$0xff] %v1788_v61  ;;  %v1162_v22 = vadd.f32 %v1161_v62, %v2796_v19  ;;  %v1235_v23 = vadd.f32 %v1234_v21, %v2799_v38 }
 0x26e   : > { %v1165_v0 = vpop.f32.mrf.mxu0  ;;  %v1238_v1 = vpop.f32.mrf.mxu1 }
 0x26f   : > { %v1790_v45 = vpack.c.bf16 %v1162_v22, %v1160_v9  ;;  %v1791_v2 = vpack.c.bf16 %v1235_v23, %v1233_v48  ;;  %v1166_v7 = vadd.f32 %v1165_v0, %v2789_v42  ;;  %v1239_v3 = vadd.f32 %v1238_v1, %v2792_v46 }
 0x270   : > { %v1167_v29 = vpop.f32.mrf.mxu0  ;;  %v1240_v30 = vpop.f32.mrf.mxu1 }
 0x271   : > { %1487 = vst [vmem:[%s2806_s6 + $0x18] sm:$0xff] %v1790_v45  ;;  %1488 = vst [vmem:[%s2806_s6 + $0x20] sm:$0xff] %v1791_v2  ;;  %v1168_v31 = vadd.f32 %v1167_v29, %v2796_v19  ;;  %v1241_v32 = vadd.f32 %v1240_v30, %v2799_v38  ;;  %v629_v29 = vsub.s32 4, %v2677_v16  ;;  %v633_v30 = vsub.s32 5, %v2677_v16 }
 0x272   : > { %v1169_v63 = vpop.f32.mrf.mxu0  ;;  %v1242_v47 = vpop.f32.mrf.mxu1 }
 0x273   : > { %v1793_v33 = vpack.c.bf16 %v1168_v31, %v1166_v7  ;;  %v1794_v44 = vpack.c.bf16 %v1241_v32, %v1239_v3  ;;  %v1170_v24 = vadd.f32 %v1169_v63, %v2789_v42  ;;  %v1243_v34 = vadd.f32 %v1242_v47, %v2792_v46 }
 0x274   : > { %v1171_v5 = vpop.f32.mrf.mxu0  ;;  %v1244_v6 = vpop.f32.mrf.mxu1  ;;  %v630_v7 = vrot.slane %v2785_v51, %v629_v29  ;;  %v634_v3 = vrot.slane %v2785_v51, %v633_v30 }
 0x275   : > { %1490 = vst [vmem:[%s2806_s6 + $0x30] sm:$0xff] %v1793_v33  ;;  %1491 = vst [vmem:[%s2806_s6 + $0x38] sm:$0xff] %v1794_v44  ;;  %v1172_v8 = vadd.f32 %v1171_v5, %v2796_v19  ;;  %v1245_v18 = vadd.f32 %v1244_v6, %v2799_v38 }
 0x276   : > { %v1175_v36 = vpop.f32.mrf.mxu0  ;;  %v1248_v4 = vpop.f32.mrf.mxu1 }
 0x277   : > { %v1796_v25 = vpack.c.bf16 %v1172_v8, %v1170_v24  ;;  %v1797_v26 = vpack.c.bf16 %v1245_v18, %v1243_v34  ;;  %v1176_v41 = vadd.f32 %v1175_v36, %v2789_v42  ;;  %v1249_v12 = vadd.f32 %v1248_v4, %v2792_v46 }
 0x278   : > { %v1177_v11 = vpop.f32.mrf.mxu0  ;;  %v1250_v39 = vpop.f32.mrf.mxu1 }
 0x279   : > { %1493 = vst [vmem:[%s2806_s6 + $0x48] sm:$0xff] %v1796_v25  ;;  %1494 = vst [vmem:[%s2806_s6 + $0x50] sm:$0xff] %v1797_v26  ;;  %v1178_v40 = vadd.f32 %v1177_v11, %v2796_v19  ;;  %v1251_v13 = vadd.f32 %v1250_v39, %v2799_v38 }
 0x27a   : > { %v1179_v43 = vpop.f32.mrf.mxu0  ;;  %v1252_v14 = vpop.f32.mrf.mxu1 }
 0x27b   : > { %v1799_v15 = vpack.c.bf16 %v1178_v40, %v1176_v41  ;;  %v1800_v27 = vpack.c.bf16 %v1251_v13, %v1249_v12  ;;  %v1180_v35 = vadd.f32 %v1179_v43, %v2789_v42  ;;  %v1253_v49 = vadd.f32 %v1252_v14, %v2792_v46 }
 0x27c   : > { %v1181_v10 = vpop.f32.mrf.mxu0  ;;  %v1254_v28 = vpop.f32.mrf.mxu1 }
 0x27d   : > { %1496 = vst [vmem:[%s2806_s6 + $0x60] sm:$0xff] %v1799_v15  ;;  %1497 = vst [vmem:[%s2806_s6 + $0x68] sm:$0xff] %v1800_v27  ;;  %v1182_v50 = vadd.f32 %v1181_v10, %v2796_v19  ;;  %v1255_v17 = vadd.f32 %v1254_v28, %v2799_v38 }
 0x27e   : > { %v1185_v52 = vpop.f32.mrf.mxu0  ;;  %v1258_v53 = vpop.f32.mrf.mxu1 }
 0x27f   : > { %v1802_v20 = vpack.c.bf16 %v1182_v50, %v1180_v35  ;;  %v1803_v56 = vpack.c.bf16 %v1255_v17, %v1253_v49  ;;  %v1186_v58 = vadd.f32 %v1185_v52, %v2789_v42  ;;  %v1259_v59 = vadd.f32 %v1258_v53, %v2792_v46 }
 0x280   : > { %v1187_v57 = vpop.f32.mrf.mxu0  ;;  %v1260_v55 = vpop.f32.mrf.mxu1 }
 0x281   : > { %1499 = vst [vmem:[%s2806_s6 + $0x78] sm:$0xff] %v1802_v20  ;;  %1500 = vst [vmem:[%s2806_s6 + $0x80] sm:$0xff] %v1803_v56  ;;  %v1188_v60 = vadd.f32 %v1187_v57, %v2796_v19  ;;  %v1261_v37 = vadd.f32 %v1260_v55, %v2799_v38 }
 0x282   : > { %v1189_v54 = vpop.f32.mrf.mxu0  ;;  %v1262_v61 = vpop.f32.mrf.mxu1 }
 0x283   : > { %v1805_v62 = vpack.c.bf16 %v1188_v60, %v1186_v58  ;;  %v1806_v21 = vpack.c.bf16 %v1261_v37, %v1259_v59  ;;  %v1190_v22 = vadd.f32 %v1189_v54, %v2789_v42  ;;  %v1263_v23 = vadd.f32 %v1262_v61, %v2792_v46 }
 0x284   : > { %v1191_v9 = vpop.f32.mrf.mxu0  ;;  %v1264_v48 = vpop.f32.mrf.mxu1 }
 0x285   : > { %1502 = vst [vmem:[%s2806_s6 + $0x90] sm:$0xff] %v1805_v62  ;;  %1503 = vst [vmem:[%s2806_s6 + $0x98] sm:$0xff] %v1806_v21  ;;  %v1192_v0 = vadd.f32 %v1191_v9, %v2796_v19  ;;  %v1265_v1 = vadd.f32 %v1264_v48, %v2799_v38 }
 0x287   : > { %v1808_v45 = vpack.c.bf16 %v1192_v0, %v1190_v22  ;;  %v1809_v2 = vpack.c.bf16 %v1265_v1, %v1263_v23 }
 0x289   : > { %1505 = vst [vmem:[%s2806_s6 + $0xa8] sm:$0xff] %v1808_v45  ;;  %1506 = vst [vmem:[%s2806_s6 + $0xb0] sm:$0xff] %v1809_v2 }
 0x2a6   : > { %v1301_v42 = vpop.f32.mrf.mxu0  ;;  %v1321_v46 = vpop.f32.mrf.mxu1 }
 0x2a7   : > { %v1302_v38 = vadd.f32 %v1301_v42, %v630_v7  ;;  %v1322_v32 = vadd.f32 %v1321_v46, %v630_v7 }
 0x2a8   : > { %v1303_v19 = vpop.f32.mrf.mxu0  ;;  %v1323_v31 = vpop.f32.mrf.mxu1 }
 0x2a9   : > { %v1304_v63 = vadd.f32 %v1303_v19, %v634_v3  ;;  %v1324_v47 = vadd.f32 %v1323_v31, %v634_v3 }
 0x2aa   : > { %v1305_v33 = vpop.f32.mrf.mxu0  ;;  %v1325_v44 = vpop.f32.mrf.mxu1 }
 0x2ab   : > { %v1789_v5 = vpack.c.bf16 %v1304_v63, %v1302_v38  ;;  %v1801_v16 = vpack.c.bf16 %v1324_v47, %v1322_v32  ;;  %v1306_v51 = vadd.f32 %v1305_v33, %v630_v7  ;;  %v1326_v34 = vadd.f32 %v1325_v44, %v630_v7 }
 0x2ac   : > { %v1307_v6 = vpop.f32.mrf.mxu0  ;;  %v1327_v24 = vpop.f32.mrf.mxu1 }
 0x2ad   : > { %1486 = vst [vmem:[%s2806_s6 + $0x10] sm:$0xff] %v1789_v5  ;;  %1498 = vst [vmem:[%s2806_s6 + $0x70] sm:$0xff] %v1801_v16  ;;  %v1308_v8 = vadd.f32 %v1307_v6, %v634_v3  ;;  %v1328_v18 = vadd.f32 %v1327_v24, %v634_v3 }
 0x2ae   : > { %v1311_v36 = vpop.f32.mrf.mxu0  ;;  %v1331_v4 = vpop.f32.mrf.mxu1 }
 0x2af   : > { %v1792_v25 = vpack.c.bf16 %v1308_v8, %v1306_v51  ;;  %v1804_v26 = vpack.c.bf16 %v1328_v18, %v1326_v34  ;;  %v1312_v41 = vadd.f32 %v1311_v36, %v630_v7  ;;  %v1332_v12 = vadd.f32 %v1331_v4, %v630_v7 }
 0x2b0   : > { %v1313_v11 = vpop.f32.mrf.mxu0  ;;  %v1333_v39 = vpop.f32.mrf.mxu1 }
 0x2b1   : > { %1489 = vst [vmem:[%s2806_s6 + $0x28] sm:$0xff] %v1792_v25  ;;  %1501 = vst [vmem:[%s2806_s6 + $0x88] sm:$0xff] %v1804_v26  ;;  %v1314_v40 = vadd.f32 %v1313_v11, %v634_v3  ;;  %v1334_v13 = vadd.f32 %v1333_v39, %v634_v3 }
 0x2b2   : > { %v1315_v43 = vpop.f32.mrf.mxu0  ;;  %v1335_v14 = vpop.f32.mrf.mxu1 }
 0x2b3   : > { %v1795_v15 = vpack.c.bf16 %v1314_v40, %v1312_v41  ;;  %v1807_v27 = vpack.c.bf16 %v1334_v13, %v1332_v12  ;;  %v1316_v35 = vadd.f32 %v1315_v43, %v630_v7  ;;  %v1336_v49 = vadd.f32 %v1335_v14, %v630_v7 }
 0x2b4   : > { %v1317_v10 = vpop.f32.mrf.mxu0  ;;  %v1337_v28 = vpop.f32.mrf.mxu1 }
 0x2b5   : > { %1492 = vst [vmem:[%s2806_s6 + $0x40] sm:$0xff] %v1795_v15  ;;  %1504 = vst [vmem:[%s2806_s6 + $0xa0] sm:$0xff] %v1807_v27  ;;  %v1318_v50 = vadd.f32 %v1317_v10, %v634_v3  ;;  %v1338_v17 = vadd.f32 %v1337_v28, %v634_v3 }
 0x2b7   : > { %v1798_v52 = vpack.c.bf16 %v1318_v50, %v1316_v35  ;;  %v1810_v53 = vpack.c.bf16 %v1338_v17, %v1336_v49 }
 0x2b9   : > { %1495 = vst [vmem:[%s2806_s6 + $0x58] sm:$0xff] %v1798_v52  ;;  %1507 = vst [vmem:[%s2806_s6 + $0xb8] sm:$0xff] %v1810_v53 }
 0x2ba   : > { %2240 = shalt.err (!%p2237_p11)
}
 0x2bb   : > { %s2241_s16 = scalar_lea.hbm %s2870_s11, 3072  ;;  %s2245_s1 = scalar_lea.hbm %s2930_s5, 12288 }
 0x2bc   : > { %p2242_p5 = scmp.ne.s32.totalorder %s2870_s11, %s2241_s16  ;;  %p2246_p12 = scmp.lt.s32.totalorder %s2870_s11, %s2930_s5 }
 0x2bd   : > { %p2247_p10 = scmp.lt.s32.totalorder %s2245_s1, %s2241_s16 }
 0x2be   : > { %p2243_p7 = pnand %p2242_p5, %p2496_p13 }
 0x2bf   : > { %p2248_p0 = por %p2247_p10, %p2246_p12 }
 0x2c0   : > { %p2244_p9 = pneg %p2243_p7 }
 0x2c2   : > { %p2249_p1 = pnand %p2248_p0, %p2244_p9 }
 0x2c4   : > { %2252 = shalt.err (!%p2249_p1)
}
 0x2c5   : > { %s2342_s6 = smov 384   ;;  %s2343_s7 = smov 24  }
 0x2c6   : > { %1860 = dma.vmem_to_hbm [thread:$0]  (%p2496_p13), %s2865_s22, 3072, %s2870_s11, %s1509_s26, %s2342_s6, %s2342_s6, %s2343_s7  }
 0x2c7 PF: > { %s2962_s29 = sld [smem:[#allocation15_spill]]  ;;  %p1887_p6 = scmp.ge.s32.totalorder %s2331_s25, 2 }
 0x2c8   : > { %s2963_s21 = sld [smem:[#allocation17_spill]] }
 0x2cd   : > { %s1540_s15 = sand.u32 1, %s2962_s29  }
 0x2ce   : > { %p2964_p3 = scmp.ne.s32.totalorder %s2963_s21, 0  ;;  %s1541_s27 = scalar_lea.sflag [#allocation4], %s1540_s15 }
 0x2d0   : > { %p1877_p4 = pnand %p1887_p6, %p2964_p3 }
 0x2d2   : > { %p1878_p2 = pneg %p1877_p4 }
 0x2d4   : > { %2298 = dma.done.wait (%p1878_p2), %s1541_s27, 3072  }
 0x2d5   : > { %2300 = vsyncadd (%p1878_p2), %s1541_s27, 4294964224  ;;  %s23_s25 = sadd.s32 1, %s2331_s25   ;;  %s2965_s21 = sld [smem:[#allocation16_spill]] }
 0x2d6   : > { %p20_p8 = scmp.ge.s32.totalorder %s23_s25, 6   ;;  %s2966_s23 = sld [smem:[#allocation18_spill]] }
 0x2d7   : > { %s2967_s18 = smov %s2307_s19  ;;  %s2968_s19 = smov %s2311_s20 }
 0x2d8   : > { %s2969_s20 = smov %s2513_s2  ;;  %s2970_s22 = smov %s2327_s24 }
 0x2d9   : > { %s2971_s24 = smov %s2977_s17  ;;  %22 = sbr.rel (!%p20_p8) target bundleno = 13 (0xd), region = 97 }
 0x2de   :  { %1546 = vsyncpa [#allocation3], 1 }
 0x2df   :  { %1548 = vsyncpa [#allocation3 + $0x1], 1 }
 0x2e0   :  { %1549 = vsyncpa [#allocation6], 1 }
 0x2e1   :  { %1550 = vsyncpa [#allocation9], 1 }
 0x2e2   :  { %1551 = vsyncpa [#allocation4], 1 }
 0x2e3   :  { %1553 = vsyncpa [#allocation4 + $0x1], 1 }

// kernel: tpu_custom_call.1
= control target key start
LH: loop header
LB: loop body
LE: loop exit
PB: predicated region body
PF: predicated region fallthrough
CT: control target
= control target key end

     0   :  { %s2925_s0 = inlined_call_operand.hbm [shape: f32[2,128,256], index: 0, kind: input, shape index: {}]   ;;  %s2926_s1 = inlined_call_operand.hbm [shape: f32[1,256], index: 1, kind: input, shape index: {}]   ;;  %s2927_s2 = inlined_call_operand.hbm [shape: f32[1,256], index: 2, kind: input, shape index: {}]   ;;  %s2928_s3 = inlined_call_operand.hbm [shape: bf16[256,768], index: 3, kind: input, shape index: {}]   ;;  %s2929_s4 = inlined_call_operand.vmem [shape: f32[1,768], index: 4, kind: input, shape index: {}]   ;;  %s2930_s5 = inlined_call_operand.hbm [shape: bf16[2,128,768], index: 5, kind: output, shape index: {}]  }
   0x1   :  { %2939 = sst [smem:[#allocation19_spill]] %s2926_s1 }
   0x2   :  { %2940 = sst [smem:[#allocation20_spill]] %s2927_s2 }
   0x3   :  { %2941 = sst [smem:[#allocation21_spill]] %s2928_s3 }
   0x4   :  { %10 = vsyncpa [#allocation3], 0 }
   0x5   :  { %12 = vsyncpa [#allocation3 + $0x1], 0 }
   0x6   :  { %13 = vsyncpa [#allocation6], 0 }
   0x7   :  { %14 = vsyncpa [#allocation9], 0 }
   0x8   :  { %15 = vsyncpa [#allocation4], 0 }
   0x9   :  { %17 = vsyncpa [#allocation4 + $0x1], 0  ;;  %s2374_s18 = smov 0   ;;  %s2376_s19 = smov 0  }
   0xa   :  { %s2378_s20 = smov 0   ;;  %s2380_s21 = smov 0  }
   0xb   :  { %s2382_s22 = smov 0   ;;  %s2384_s23 = smov 0  }
   0xc   :  { %s2386_s24 = smov 0   ;;  %s2388_s25 = smov 0  }
   0xd LB: > { %2942 = sst [smem:[#allocation15_spill]] %s2303_s18  ;;  %s1644_s26 = sadd.s32 4294967295, %s2331_s25   ;;  %s2331_s25 = sphi %s2388_s25, %s23_s25   ;;  %s2327_s24 = sphi %s2386_s24, %s2971_s24   ;;  %s2323_s23 = sphi %s2384_s23, %s2966_s23   ;;  %s2319_s22 = sphi %s2382_s22, %s2970_s22   ;;  %s2315_s21 = sphi %s2380_s21, %s2965_s21   ;;  %s2311_s20 = sphi %s2378_s20, %s2969_s20   ;;  %s2307_s19 = sphi %s2376_s19, %s2968_s19   ;;  %s2303_s18 = sphi %s2374_s18, %s2967_s18  }
   0xe   : > { %2943 = sst [smem:[#allocation16_spill]] %s2323_s23  ;;  %s1645_s27 = sadd.s32 4294967294, %s2331_s25  }
   0xf   : > { %p57_p0 = scmp.ne.s32.totalorder %s2307_s19, %s2303_s18  ;;  %p2418_p1 = scmp.eq.s32.totalorder %s1644_s26, 0 }
  0x10   : > { %p2422_p2 = scmp.eq.s32.totalorder %s1644_s26, 3  ;;  %p173_p3 = scmp.eq.s32.totalorder %s1645_s27, 3 }
  0x11   : > { %s2944_s28 = scalar_select %p2418_p1, 1, 0 }
  0x12   : > { %s2945_s29 = scalar_select %p2422_p2, 1, 0 }
  0x13   : > { %p2428_p4 = por %p2418_p1, %p57_p0  ;;  %p1646_p5 = scmp.ge.s32.totalorder %s2331_s25, 1 }
  0x14   : > { %p2433_p6 = por %p173_p3, %p57_p0  ;;  %p180_p7 = scmp.lt.s32.totalorder %s2331_s25, 5 }
  0x15   : > { %s2946_s30 = scalar_select %p2428_p4, 1, 0 }
  0x16   : > { %s2947_s6 = scalar_select %p2433_p6, 1, 0 }
  0x17   : > { %p2438_p8 = pnand %p1646_p5, %p180_p7  ;;  %s2333_s8 = smov [#allocation5]  }
  0x18   : > { %2948 = sst [smem:[#allocation17_spill]] %s2947_s6  ;;  %s193_s9 = sshll.u32 %s2333_s8, 4  ;;  %s194_s9 = int_to_ptr.vmem [resolvable:$true] %s193_s9 }
  0x19   : > { %s2949_s7 = scalar_select %p2438_p8, 1, 0 }
  0x1a   : > { %p1862_p9 = pneg %p2438_p8  ;;  %s2334_s10 = smov [#allocation7]  }
  0x1b   : > { %s204_s11 = sshll.u32 %s2334_s10, 4  ;;  %s2335_s13 = smov [#allocation8]   ;;  %s205_s11 = int_to_ptr.vmem [resolvable:$true] %s204_s11 }
  0x1c   : > { %p2446_p10 = pnand %p1862_p9, %p2418_p1  ;;  %s214_s14 = sshll.u32 %s2335_s13, 4  ;;  %s2450_s14 = int_to_ptr.vmem [resolvable:$true] %s214_s14 }
  0x1d   : > { %s2132_s15 = scalar_lea.vmem %s194_s9, 32  ;;  %p2140_p3 = scmp.lt.s32.totalorder %s194_s9, %s194_s9 }
  0x1e   : > { %p2123_p11 = pneg %p2446_p10  ;;  %p2133_p12 = scmp.ne.s32.totalorder %s194_s9, %s2132_s15 }
  0x1f   : > { %p2141_p5 = scmp.lt.s32.totalorder %s2132_s15, %s2132_s15 }
  0x20   : > { %p2135_p13 = pnand %p2133_p12, %p2123_p11 }
  0x21   : > { %p2142_p7 = por %p2141_p5, %p2140_p3 }
  0x22   : > { %p2136_p0 = pneg %p2135_p13 }
  0x24   : > { %p2143_p9 = pnand %p2142_p7, %p2136_p0 }
  0x26   : > { %2146 = shalt.err (!%p2143_p9)
}
  0x27   : > { %s2951_s1 = sld [smem:[#allocation19_spill]]  ;;  %s2158_s26 = scalar_lea.vmem %s205_s11, 32 }
  0x28   : > { %p2159_p6 = scmp.ne.s32.totalorder %s205_s11, %s2158_s26  ;;  %p2166_p12 = scmp.lt.s32.totalorder %s205_s11, %s205_s11 }
  0x29   : > { %p2167_p13 = scmp.lt.s32.totalorder %s2158_s26, %s2158_s26 }
  0x2a   : > { %p2161_p1 = pnand %p2159_p6, %p2123_p11 }
  0x2b   : > { %p2168_p8 = por %p2167_p13, %p2166_p12 }
  0x2c   : > { %p2162_p4 = pneg %p2161_p1 }
  0x2d   : > { %1865 = dma.hbm_to_vmem [thread:$0]  (!%p2446_p10), %s2951_s1, 32, %s194_s9, [#allocation6]  }
  0x2e   : > { %p2169_p2 = pnand %p2168_p8, %p2162_p4 }
  0x30   : > { %2172 = shalt.err (!%p2169_p2)
}
  0x31   : > { %s2952_s2 = sld [smem:[#allocation20_spill]]  ;;  %s2184_s9 = scalar_lea.vmem %s2450_s14, 12288 }
  0x32   : > { %p2185_p0 = scmp.ne.s32.totalorder %s2450_s14, %s2184_s9  ;;  %p2192_p3 = scmp.lt.s32.totalorder %s2450_s14, %s2450_s14 }
  0x33   : > { %p2193_p4 = scmp.lt.s32.totalorder %s2184_s9, %s2184_s9 }
  0x34   : > { %p2187_p1 = pnand %p2185_p0, %p2123_p11 }
  0x35   : > { %p2194_p2 = por %p2193_p4, %p2192_p3 }
  0x36   : > { %p2188_p6 = pneg %p2187_p1 }
  0x37   : > { %1868 = dma.hbm_to_vmem [thread:$0]  (!%p2446_p10), %s2952_s2, 32, %s205_s11, [#allocation6]  }
  0x38   : > { %p2195_p8 = pnand %p2194_p2, %p2188_p6 }
  0x3a   : > { %2198 = shalt.err (!%p2195_p8)
}
  0x3b   : > { %s2336_s10 = smov 384   ;;  %s2337_s11 = smov 24  }
  0x3c   : > { %s2953_s3 = sld [smem:[#allocation21_spill]]  ;;  %s32_s16 = sadd.s32 1, %s2323_s23 }
  0x3d   : > { %p33_p11 = scmp.ge.s32.totalorder %s32_s16, 2  ;;  %s35_s17 = sadd.s32 1, %s2327_s24 }
  0x3e   : > { %s44_s26 = sadd.s32 1, %s2311_s20  ;;  %p51_p5 = scmp.ne.s32.totalorder %s2311_s20, %s2307_s19 }
  0x3f   : > { %s2973_s16 = smov (%p33_p11, %s32_s16), 0  ;;  %s2975_s17 = smov (!%p33_p11, %s35_s17), %s2327_s24 }
  0x40   : > { %2954 = sst [smem:[#allocation18_spill]] %s2973_s16  ;;  %s40_s27 = ssub.s32 %s2323_s23, %s2973_s16 }
  0x41   : > { %p52_p7 = scmp.eq.s32.totalorder %s2331_s25, 0  ;;  %p37_p9 = scmp.ge.s32.totalorder %s2975_s17, 2 }
  0x42   : > { %1871 = dma.hbm_to_vmem [thread:$0]  (!%p2446_p10), %s2953_s3, 12288, %s2450_s14, [#allocation9], %s2336_s10, %s2336_s10, %s2337_s11  }
  0x43   : > { %p2955_p12 = scmp.ne.s32.totalorder %s2945_s29, 0  ;;  %p2500_p10 = por %p52_p7, %p51_p5 }
  0x44   : > { %p1883_p0 = scmp.lt.s32.totalorder %s2331_s25, 4  ;;  %s2977_s17 = smov (%p37_p9, %s2975_s17), 0 }
  0x45   : > { %p2496_p13 = por %p2955_p12, %p51_p5  ;;  %s231_s8 = sand.u32 1, %s2311_s20  }
  0x46   : > { %s1786_s9 = sshll.u32 %s2323_s23, 4  ;;  %s39_s10 = ssub.s32 %s2327_s24, %s2977_s17 }
  0x47   : > { %s41_s11 = sor.u32 %s40_s27, %s39_s10  ;;  %s1651_s13 = sshll.u32 %s231_s8, 7 }
  0x48   : > { %p42_p1 = scmp.eq.s32.totalorder %s41_s11, 0  ;;  %s1654_s29 = sshll.u32 %s2327_s24, 5 }
  0x49   : > { %s235_s15 = scalar_lea.vmem [#allocation2], %s1651_s13  ;;  %s242_s3 = sadd.s32 %s1786_s9, %s1654_s29 }
  0x4a   : > { %s245_s1 = sshll.u32 %s235_s15, 4  ;;  %s1655_s16 = sshll.u32 %s242_s3, 7  ;;  %s246_s1 = int_to_ptr.vmem [resolvable:$true] %s245_s1 }
  0x4b   : > { %s2513_s2 = scalar_select %p42_p1, %s2311_s20, %s44_s26  }
  0x4c   : > { %p2519_p6 = pnand %p1883_p0, %p2500_p10  ;;  %s244_s27 = scalar_lea.hbm %s2925_s0, %s1655_s16 }
  0x4d   : > { %s232_s10 = scalar_lea.sflag [#allocation3], %s231_s8  ;;  %s2212_s11 = scalar_lea.vmem %s246_s1, 2048 }
  0x4e   : > { %p2201_p3 = pneg %p2519_p6  ;;  %p2213_p4 = scmp.ne.s32.totalorder %s246_s1, %s2212_s11 }
  0x4f   : > { %s2338_s26 = smov [#allocation2]  }
  0x50   : > { %p2215_p2 = pnand %p2213_p4, %p2201_p3  ;;  %s2217_s3 = sshll.u32 %s2338_s26, 4  ;;  %s2218_s3 = int_to_ptr.vmem [resolvable:$false] %s2217_s3 }
  0x51   : > { %s2219_s14 = scalar_lea.vmem %s2218_s3, 4096  ;;  %p2220_p11 = scmp.lt.s32.totalorder %s246_s1, %s2218_s3 }
  0x52   : > { %p2216_p8 = pneg %p2215_p2  ;;  %p2221_p5 = scmp.lt.s32.totalorder %s2219_s14, %s2212_s11 }
  0x54   : > { %p2222_p7 = por %p2221_p5, %p2220_p11 }
  0x56   : > { %p2223_p9 = pnand %p2222_p7, %p2216_p8 }
  0x58   : > { %2226 = shalt.err (!%p2223_p9)
}
  0x59   : > { %s2339_s9 = smov 256   ;;  %s2340_s18 = smov 16  }
  0x5a   : > { %1875 = dma.hbm_to_vmem [thread:$0]  (!%p2519_p6), %s244_s27, 2048, %s246_s1, %s232_s10, %s2339_s9, %s2339_s9, %s2340_s18  }
  0x5b   : > { %p2959_p12 = scmp.ne.s32.totalorder %s2949_s7, 0 }
  0x5c   : > { %s2533_s23 = sand.u32 (!%p2959_p12), 1, %s2307_s19   ;;  %p2960_p10 = scmp.ne.s32.totalorder (!%p2959_p12), %s2946_s30, 0 }
  0x5d   : > { %257 = sbr.rel (%p2959_p12) target bundleno = 711 (0x2c7), region = 40  ;;  %s1657_s16 = sshll.u32 (!%p2959_p12), %s2533_s23, 7 }
  0x5e   : > { %s260_s8 = scalar_lea.sflag (!%p2959_p12), [#allocation3], %s2533_s23  ;;  %s263_s13 = scalar_lea.vmem (!%p2959_p12), [#allocation2], %s1657_s16 }
  0x62   : > { %2286 = dma.done.wait (%p2960_p10), %s260_s8, 2048  }
  0x63   : > { %2288 = vsyncadd (%p2960_p10), %s260_s8, 4294965248  ;;  %p2961_p0 = scmp.ne.s32.totalorder %s2944_s28, 0 }
  0x65   : > { %2290 = dma.done.wait (%p2961_p0), [#allocation6], 64  }
  0x66   : > { %2292 = vsyncadd (%p2961_p0), [#allocation6], 4294967232 }
  0x67   : > { %2294 = dma.done.wait (%p2961_p0), [#allocation9], 12288  }
  0x68   : > { %2296 = vsyncadd (%p2961_p0), [#allocation9], 4294955008  ;;  %v2549_v0 = vld [vmem:[%s263_s13] sm:$0xff]  ;;  %v2551_v1 = vld [vmem:[%s263_s13 + $0x8] sm:$0xff]  ;;  %s1843_s30 = smul.u32 192, %s2533_s23  ;;  %s1509_s26 = scalar_lea.sflag [#allocation4], %s2533_s23 }
  0x69   : > { %v2553_v2 = vld [vmem:[%s263_s13 + $0x20] sm:$0xff]  ;;  %v322_v3 = vadd.f32 %v2551_v1, %v2549_v0  ;;  %v2557_v4 = vld [vmem:[%s263_s13 + $0x28] sm:$0xff]  ;;  %v2559_v5 = vld [vmem:[%s263_s13 + $0x10] sm:$0xff]  ;;  %s1844_s7 = smul.u32 48, %s2315_s21  ;;  %s2341_s14 = smov [#allocation10]  }
  0x6a   : > { %v2561_v6 = vld [vmem:[%s263_s13 + $0x18] sm:$0xff]  ;;  %v328_v7 = vadd.f32 %v2557_v4, %v2553_v2  ;;  %v2565_v8 = vld [vmem:[%s263_s13 + $0x30] sm:$0xff]  ;;  %v2573_v12 = vld [vmem:[%s263_s13 + $0x40] sm:$0xff]  ;;  %s2806_s6 = scalar_lea.vmem [#allocation10], %s1843_s30  ;;  %s1845_s29 = smul.u32 96, %s2319_s22 }
  0x6b   : > { %v2567_v9 = vld [vmem:[%s263_s13 + $0x38] sm:$0xff]  ;;  %323 = vadd.xlane.f32.xlu0 %v322_v3  ;;  %v325_v10 = vadd.f32 %v2561_v6, %v2559_v5  ;;  %v2575_v13 = vld [vmem:[%s263_s13 + $0x48] sm:$0xff]  ;;  %v2577_v14 = vld [vmem:[%s263_s13 + $0x50] sm:$0xff]  ;;  %s1525_s22 = sshll.u32 %s2806_s6, 4  ;;  %s2231_s9 = sshll.u32 %s2341_s14, 4  ;;  %s2865_s22 = int_to_ptr.vmem [resolvable:$true] %s1525_s22  ;;  %s2232_s9 = int_to_ptr.vmem [resolvable:$false] %s2231_s9 }
  0x6c   : > { %329 = vadd.xlane.f32.xlu1 %v328_v7  ;;  %v331_v11 = vadd.f32 %v2567_v9, %v2565_v8  ;;  %v2579_v15 = vld [vmem:[%s263_s13 + $0x58] sm:$0xff]  ;;  %v2581_v16 = vld [vmem:[%s263_s13 + $0x60] sm:$0xff]  ;;  %v2583_v17 = vld [vmem:[%s263_s13 + $0x68] sm:$0xff]  ;;  %v334_v18 = vadd.f32 %v2575_v13, %v2573_v12  ;;  %s1522_s21 = sadd.s32 %s1845_s29, %s1844_s7  ;;  %s2227_s3 = scalar_lea.vmem %s2865_s22, 3072 }
  0x6d   : > { %v2587_v19 = vld [vmem:[%s263_s13 + $0x70] sm:$0xff]  ;;  %v2589_v20 = vld [vmem:[%s263_s13 + $0x78] sm:$0xff]  ;;  %v337_v21 = vadd.f32 %v2579_v15, %v2577_v14  ;;  %v340_v22 = vadd.f32 %v2583_v17, %v2581_v16  ;;  %v1967_v28 = vld [vmem:[#allocation8 + $0x124] ss:$24 sps:$4 sm:$0xff]   ;;  %s1783_s15 = sshll.u32 %s1522_s21, 6  ;;  %p2228_p1 = scmp.ne.s32.totalorder %s2865_s22, %s2227_s3 }
  0x6e   : > { %v343_v23 = vadd.f32 %v2589_v20, %v2587_v19  ;;  %v1961_v24 = vld [vmem:[#allocation8 + $0x154] ss:$24 sps:$4 sm:$0xff]   ;;  %v1965_v26 = vld [vmem:[#allocation8 + $0x150] ss:$24 sps:$4 sm:$0xff]   ;;  %v1971_v30 = vld [vmem:[#allocation8 + $0x120] ss:$24 sps:$4 sm:$0xff]   ;;  %s2870_s11 = scalar_lea.hbm %s2930_s5, %s1783_s15  ;;  %p2234_p4 = scmp.lt.s32.totalorder %s2865_s22, %s2232_s9 }
  0x6f   : > { %326 = vadd.xlane.f32.xlu0 %v325_v10  ;;  %v1963_v25 = vld [vmem:[#allocation8 + $0x15c] ss:$24 sps:$4 sm:$0xff]   ;;  %v1966_v27 = vld [vmem:[#allocation8 + $0x158] ss:$24 sps:$4 sm:$0xff]   ;;  %v1969_v29 = vld [vmem:[#allocation8 + $0x12c] ss:$24 sps:$4 sm:$0xff]   ;;  %1121 = vmatprep.subr.bf16.mxu0 %v1961_v24  ;;  %p2229_p6 = pnand %p2228_p1, %p2496_p13 }
  0x70   : > { %332 = vadd.xlane.f32.xlu1 %v331_v11  ;;  %1194 = vmatprep.subr.bf16.mxu1 %v1963_v25  ;;  %v1972_v31 = vld [vmem:[#allocation8 + $0x128] ss:$24 sps:$4 sm:$0xff]   ;;  %v1973_v32 = vld [vmem:[#allocation8 + $0xf4] ss:$24 sps:$4 sm:$0xff]   ;;  %v1978_v35 = vld [vmem:[#allocation8 + $0xf8] ss:$24 sps:$4 sm:$0xff]  }
  0x71   : > { %1122 = vmatpush1.bf16.msra.mxu0 %v1965_v26  ;;  %1195 = vmatpush1.bf16.msra.mxu1 %v1966_v27  ;;  %v1975_v33 = vld [vmem:[#allocation8 + $0xfc] ss:$24 sps:$4 sm:$0xff]   ;;  %v1977_v34 = vld [vmem:[#allocation8 + $0xf0] ss:$24 sps:$4 sm:$0xff]   ;;  %v1981_v37 = vld [vmem:[#allocation8 + $0xcc] ss:$24 sps:$4 sm:$0xff]   ;;  %p2230_p3 = pneg %p2229_p6 }
  0x72   : > { %1123 = vmatprep.subr.bf16.mxu0 %v1967_v28  ;;  %1196 = vmatprep.subr.bf16.mxu1 %v1969_v29  ;;  %v1979_v36 = vld [vmem:[#allocation8 + $0xc4] ss:$24 sps:$4 sm:$0xff]   ;;  %v1983_v38 = vld [vmem:[#allocation8 + $0xc0] ss:$24 sps:$4 sm:$0xff]   ;;  %v1985_v40 = vld [vmem:[#allocation8 + $0x94] ss:$24 sps:$4 sm:$0xff]  }
  0x73   : > { %335 = vadd.xlane.f32.xlu0 %v334_v18  ;;  %v1984_v39 = vld [vmem:[#allocation8 + $0xc8] ss:$24 sps:$4 sm:$0xff]   ;;  %v1987_v41 = vld [vmem:[#allocation8 + $0x9c] ss:$24 sps:$4 sm:$0xff]   ;;  %v1990_v43 = vld [vmem:[#allocation8 + $0x98] ss:$24 sps:$4 sm:$0xff]  }
  0x74   : > { %338 = vadd.xlane.f32.xlu1 %v337_v21  ;;  %v1989_v42 = vld [vmem:[#allocation8 + $0x90] ss:$24 sps:$4 sm:$0xff]   ;;  %v1991_v44 = vld [vmem:[#allocation8 + $0x64] ss:$24 sps:$4 sm:$0xff]   ;;  %v1995_v46 = vld [vmem:[#allocation8 + $0x60] ss:$24 sps:$4 sm:$0xff]  }
  0x75   : > { %1124 = vmatpush1.bf16.msra.mxu0 %v1971_v30  ;;  %1197 = vmatpush1.bf16.msra.mxu1 %v1972_v31  ;;  %v1993_v45 = vld [vmem:[#allocation8 + $0x6c] ss:$24 sps:$4 sm:$0xff]   ;;  %v1996_v47 = vld [vmem:[#allocation8 + $0x68] ss:$24 sps:$4 sm:$0xff]   ;;  %v1999_v49 = vld [vmem:[#allocation8 + $0x3c] ss:$24 sps:$4 sm:$0xff]  }
  0x76   : > { %1125 = vmatprep.subr.bf16.mxu0 %v1973_v32  ;;  %1198 = vmatprep.subr.bf16.mxu1 %v1975_v33  ;;  %v1997_v48 = vld [vmem:[#allocation8 + $0x34] ss:$24 sps:$4 sm:$0xff]   ;;  %v2001_v50 = vld [vmem:[#allocation8 + $0x30] ss:$24 sps:$4 sm:$0xff]   ;;  %v2003_v52 = vld [vmem:[#allocation8 + $0x4] ss:$24 sps:$4 sm:$0xff]  }
  0x77   : > { %341 = vadd.xlane.f32.xlu0 %v340_v22  ;;  %v2002_v51 = vld [vmem:[#allocation8 + $0x38] ss:$24 sps:$4 sm:$0xff]   ;;  %v2005_v53 = vld [vmem:[#allocation8 + $0xc] ss:$24 sps:$4 sm:$0xff]   ;;  %v2008_v55 = vld [vmem:[#allocation8 + $0x8] ss:$24 sps:$4 sm:$0xff]  }
  0x78   : > { %344 = vadd.xlane.f32.xlu1 %v343_v23  ;;  %v2007_v54 = vld [vmem:[#allocation8] ss:$24 sps:$4 sm:$0xff]   ;;  %v2009_v56 = vld [vmem:[#allocation8 + $0x2d4] ss:$24 sps:$4 sm:$0xff]   ;;  %v2013_v58 = vld [vmem:[#allocation8 + $0x2d0] ss:$24 sps:$4 sm:$0xff]  }
  0x79   : > { %1126 = vmatpush1.bf16.msra.mxu0 %v1977_v34  ;;  %1199 = vmatpush1.bf16.msra.mxu1 %v1978_v35  ;;  %v2011_v57 = vld [vmem:[#allocation8 + $0x2dc] ss:$24 sps:$4 sm:$0xff]   ;;  %v2014_v59 = vld [vmem:[#allocation8 + $0x2d8] ss:$24 sps:$4 sm:$0xff]   ;;  %s2233_s18 = scalar_lea.vmem %s2232_s9, 6144 }
  0x7a   : > { %1127 = vmatprep.subr.bf16.mxu0 %v1979_v36  ;;  %1200 = vmatprep.subr.bf16.mxu1 %v1981_v37  ;;  %p2235_p2 = scmp.lt.s32.totalorder %s2233_s18, %s2227_s3 }
  0x7c   : > { %p2236_p8 = por %p2235_p2, %p2234_p4 }
  0x7d   : > { %1128 = vmatpush1.bf16.msra.mxu0 %v1983_v38  ;;  %1201 = vmatpush1.bf16.msra.mxu1 %v1984_v39 }
  0x7e   : > { %1129 = vmatprep.subr.bf16.mxu0 %v1985_v40  ;;  %1202 = vmatprep.subr.bf16.mxu1 %v1987_v41  ;;  %p2237_p11 = pnand %p2236_p8, %p2230_p3 }
  0x81   : > { %1130 = vmatpush1.bf16.msra.mxu0 %v1989_v42  ;;  %1203 = vmatpush1.bf16.msra.mxu1 %v1990_v43 }
  0x82   : > { %1131 = vmatprep.subr.bf16.mxu0 %v1991_v44  ;;  %1204 = vmatprep.subr.bf16.mxu1 %v1993_v45 }
  0x85   : > { %1132 = vmatpush1.bf16.msra.mxu0 %v1995_v46  ;;  %1205 = vmatpush1.bf16.msra.mxu1 %v1996_v47 }
  0x86   : > { %1133 = vmatprep.subr.bf16.mxu0 %v1997_v48  ;;  %1206 = vmatprep.subr.bf16.mxu1 %v1999_v49 }
  0x89   : > { %1134 = vmatpush1.bf16.msra.mxu0 %v2001_v50  ;;  %1207 = vmatpush1.bf16.msra.mxu1 %v2002_v51 }
  0x8a   : > { %1135 = vmatprep.subr.bf16.mxu0 %v2003_v52  ;;  %1208 = vmatprep.subr.bf16.mxu1 %v2005_v53  ;;  %v2015_v52 = vld [vmem:[#allocation8 + $0x2a4] ss:$24 sps:$4 sm:$0xff]  }
  0x8b   : > { %v2017_v53 = vld [vmem:[#allocation8 + $0x2ac] ss:$24 sps:$4 sm:$0xff]  }
  0x8d   : > { %1136 = vmatpush1.bf16.msra.mxu0 %v2007_v54  ;;  %1209 = vmatpush1.bf16.msra.mxu1 %v2008_v55  ;;  %v2020_v54 = vld [vmem:[#allocation8 + $0x2a8] ss:$24 sps:$4 sm:$0xff]  }
  0x8e   : > { %1137 = vmatprep.subr.bf16.mxu0 %v2009_v56  ;;  %1210 = vmatprep.subr.bf16.mxu1 %v2011_v57  ;;  %v2021_v56 = vld [vmem:[#allocation8 + $0x274] ss:$24 sps:$4 sm:$0xff]  }
  0x8f   : > { %v2023_v57 = vld [vmem:[#allocation8 + $0x27c] ss:$24 sps:$4 sm:$0xff]  }
  0x91   : > { %1138 = vmatpush2.bf16.msra.mxu0 %v2013_v58  ;;  %1211 = vmatpush2.bf16.msra.mxu1 %v2014_v59  ;;  %v2025_v58 = vld [vmem:[#allocation8 + $0x270] ss:$24 sps:$4 sm:$0xff]  }
  0x92   : > { %1139 = vmatprep.subr.bf16.mxu0 %v2015_v52  ;;  %1212 = vmatprep.subr.bf16.mxu1 %v2017_v53  ;;  %v2026_v59 = vld [vmem:[#allocation8 + $0x278] ss:$24 sps:$4 sm:$0xff]  }
  0x95   : > { %1213 = vmatpush2.bf16.msra.mxu1 %v2020_v54 }
  0x96   : > { %1214 = vmatprep.subr.bf16.mxu1 %v2023_v57  ;;  %v320_v57 = vld [vmem:[#allocation5] sm:$0x3] }
  0x99   : > { %1215 = vmatpush2.bf16.msra.mxu1 %v2026_v59 }
  0xf4   : > { %v324_v60 = vpop.xlane.xlu0 %323 }
  0xf5   : > { %v347_v61 = vmul.f32 0.00390625, %v324_v60  ;;  %v330_v62 = vpop.xlane.xlu1 %329  ;;  %v2027_v60 = vld [vmem:[#allocation8 + $0x244] ss:$24 sps:$4 sm:$0xff]  }
  0xf6   : > { %v349_v63 = vmul.f32 0.00390625, %v330_v62  ;;  %v2031_v62 = vld [vmem:[#allocation8 + $0x240] ss:$24 sps:$4 sm:$0xff]  }
  0xf7   : > { %v2598_v3 = vsub.f32 %v2549_v0, %v347_v61  ;;  %v2601_v7 = vsub.f32 %v2551_v1, %v347_v61  ;;  %v2029_v61 = vld [vmem:[#allocation8 + $0x24c] ss:$24 sps:$4 sm:$0xff]  }
  0xf8   : > { %v2604_v10 = vsub.f32 %v2553_v2, %v349_v63  ;;  %v2607_v11 = vsub.f32 %v2557_v4, %v349_v63  ;;  %v327_v18 = vpop.xlane.xlu0 %326  ;;  %v2032_v63 = vld [vmem:[#allocation8 + $0x248] ss:$24 sps:$4 sm:$0xff]   ;;  %1216 = vmatprep.subr.bf16.mxu1 %v2029_v61 }
  0xf9   : > { %v348_v21 = vmul.f32 0.00390625, %v327_v18  ;;  %v333_v22 = vpop.xlane.xlu1 %332  ;;  %v371_v23 = vmul.f32 %v2598_v3, %v2598_v3  ;;  %v372_v24 = vmul.f32 %v2601_v7, %v2601_v7  ;;  %1217 = vmatpush2.bf16.msra.mxu1 %v2032_v63  ;;  %v2033_v18 = vld [vmem:[#allocation8 + $0x214] ss:$24 sps:$4 sm:$0xff]  }
  0xfa   : > { %v350_v0 = vmul.f32 0.00390625, %v333_v22  ;;  %v375_v1 = vmul.f32 %v2604_v10, %v2604_v10  ;;  %v376_v2 = vmul.f32 %v2607_v11, %v2607_v11  ;;  %v2037_v22 = vld [vmem:[#allocation8 + $0x210] ss:$24 sps:$4 sm:$0xff]  }
  0xfb   : > { %v2618_v25 = vsub.f32 %v2559_v5, %v348_v21  ;;  %v2621_v4 = vsub.f32 %v2561_v6, %v348_v21  ;;  %v387_v26 = vadd.f32 %v372_v24, %v371_v23  ;;  %v2035_v21 = vld [vmem:[#allocation8 + $0x21c] ss:$24 sps:$4 sm:$0xff]   ;;  %v2038_v23 = vld [vmem:[#allocation8 + $0x218] ss:$24 sps:$4 sm:$0xff]  }
  0xfc   : > { %v2624_v27 = vsub.f32 %v2565_v8, %v350_v0  ;;  %v2627_v28 = vsub.f32 %v2567_v9, %v350_v0  ;;  %v336_v29 = vpop.xlane.xlu0 %335  ;;  %v393_v32 = vadd.f32 %v376_v2, %v375_v1  ;;  %1218 = vmatprep.subr.bf16.mxu1 %v2035_v21  ;;  %v2039_v24 = vld [vmem:[#allocation8 + $0x1e4] ss:$24 sps:$4 sm:$0xff]   ;;  %v2043_v1 = vld [vmem:[#allocation8 + $0x1e0] ss:$24 sps:$4 sm:$0xff]  }
  0xfd   : > { %v351_v30 = vmul.f32 0.00390625, %v336_v29  ;;  %388 = vadd.xlane.f32.xlu0 %v387_v26  ;;  %v339_v31 = vpop.xlane.xlu1 %338  ;;  %v373_v33 = vmul.f32 %v2618_v25, %v2618_v25  ;;  %v374_v5 = vmul.f32 %v2621_v4, %v2621_v4  ;;  %1219 = vmatpush2.bf16.msra.mxu1 %v2038_v23  ;;  %v2041_v0 = vld [vmem:[#allocation8 + $0x1ec] ss:$24 sps:$4 sm:$0xff]   ;;  %v2044_v2 = vld [vmem:[#allocation8 + $0x1e8] ss:$24 sps:$4 sm:$0xff]  }
  0xfe   : > { %v352_v6 = vmul.f32 0.00390625, %v339_v31  ;;  %v377_v34 = vmul.f32 %v2624_v27, %v2624_v27  ;;  %v378_v8 = vmul.f32 %v2627_v28, %v2627_v28  ;;  %1220 = vmatprep.subr.bf16.mxu1 %v2041_v0  ;;  %v2045_v26 = vld [vmem:[#allocation8 + $0x1b4] ss:$24 sps:$4 sm:$0xff]   ;;  %v2050_v31 = vld [vmem:[#allocation8 + $0x1b8] ss:$24 sps:$4 sm:$0xff]  }
  0xff   : > { %v2638_v9 = vsub.f32 %v2573_v12, %v351_v30  ;;  %v2641_v35 = vsub.f32 %v2575_v13, %v351_v30  ;;  %v390_v36 = vadd.f32 %v374_v5, %v373_v33  ;;  %v2047_v29 = vld [vmem:[#allocation8 + $0x1bc] ss:$24 sps:$4 sm:$0xff]   ;;  %v2049_v30 = vld [vmem:[#allocation8 + $0x1b0] ss:$24 sps:$4 sm:$0xff]   ;;  %v2053_v33 = vld [vmem:[#allocation8 + $0x18c] ss:$24 sps:$4 sm:$0xff]  }
 0x100   : > { %v2644_v37 = vsub.f32 %v2577_v14, %v352_v6  ;;  %v2647_v38 = vsub.f32 %v2579_v15, %v352_v6  ;;  %v342_v39 = vpop.xlane.xlu0 %341  ;;  %v396_v42 = vadd.f32 %v378_v8, %v377_v34  ;;  %v2055_v5 = vld [vmem:[#allocation8 + $0x180] ss:$24 sps:$4 sm:$0xff]   ;;  %v2059_v34 = vld [vmem:[#allocation8 + $0x164] ss:$24 sps:$4 sm:$0xff]  }
 0x101   : > { %v353_v40 = vmul.f32 0.00390625, %v342_v39  ;;  %394 = vadd.xlane.f32.xlu0 %v393_v32  ;;  %391 = vadd.xlane.f32.xlu1 %v390_v36  ;;  %v345_v41 = vpop.xlane.xlu1 %344  ;;  %v379_v12 = vmul.f32 %v2638_v9, %v2638_v9  ;;  %v380_v13 = vmul.f32 %v2641_v35, %v2641_v35  ;;  %v2051_v32 = vld [vmem:[#allocation8 + $0x184] ss:$24 sps:$4 sm:$0xff]   ;;  %v2056_v6 = vld [vmem:[#allocation8 + $0x188] ss:$24 sps:$4 sm:$0xff]  }
 0x102   : > { %v354_v43 = vmul.f32 0.00390625, %v345_v41  ;;  %v381_v14 = vmul.f32 %v2644_v37, %v2644_v37  ;;  %v382_v15 = vmul.f32 %v2647_v38, %v2647_v38  ;;  %1221 = vmatpush2.bf16.msra.mxu1 %v2044_v2 }
 0x103   : > { %v2658_v44 = vsub.f32 %v2581_v16, %v353_v40  ;;  %v2661_v45 = vsub.f32 %v2583_v17, %v353_v40  ;;  %v399_v46 = vadd.f32 %v380_v13, %v379_v12  ;;  %1222 = vmatprep.subr.bf16.mxu1 %v2047_v29  ;;  %v452_v13 = vlaneseq }
 0x104   : > { %v2664_v47 = vsub.f32 %v2587_v19, %v354_v43  ;;  %v2667_v48 = vsub.f32 %v2589_v20, %v354_v43  ;;  %v402_v49 = vadd.f32 %v382_v15, %v381_v14  ;;  %v2019_v20 = vld [vmem:[#allocation8 + $0x2a0] ss:$24 sps:$4 sm:$0xff]  }
 0x105   : > { %397 = vadd.xlane.f32.xlu1 %v396_v42  ;;  %400 = vadd.xlane.f32.xlu0 %v399_v46  ;;  %v383_v50 = vmul.f32 %v2658_v44, %v2658_v44  ;;  %v384_v16 = vmul.f32 %v2661_v45, %v2661_v45 }
 0x106   : > { %v385_v17 = vmul.f32 %v2664_v47, %v2664_v47  ;;  %v386_v51 = vmul.f32 %v2667_v48, %v2667_v48  ;;  %1140 = vmatpush2.bf16.msra.mxu0 %v2019_v20  ;;  %1223 = vmatpush2.bf16.msra.mxu1 %v2050_v31 }
 0x107   : > { %v405_v19 = vadd.f32 %v384_v16, %v383_v50  ;;  %1141 = vmatprep.subr.bf16.mxu0 %v2021_v56  ;;  %1224 = vmatprep.subr.bf16.mxu1 %v2053_v33  ;;  %v2677_v16 = vshrl.u32 %v452_v13, 7 }
 0x108   : > { %v408_v55 = vadd.f32 %v386_v51, %v385_v17 }
 0x109   : > { %403 = vadd.xlane.f32.xlu1 %v402_v49  ;;  %406 = vadd.xlane.f32.xlu0 %v405_v19  ;;  %v2680_v54 = vsub.s32 1, %v2677_v16 }
 0x10a   : > { %1142 = vmatpush2.bf16.msra.mxu0 %v2025_v58  ;;  %1225 = vmatpush2.bf16.msra.mxu1 %v2056_v6 }
 0x10b   : > { %1143 = vmatprep.subr.bf16.mxu0 %v2027_v60  ;;  %1811 = vmatprep.subr.bf16.mxu1 %v2059_v34  ;;  %v2686_v63 = vrot.slane %v320_v57, %v2680_v54 }
 0x10d   : > { %409 = vadd.xlane.f32.xlu1 %v408_v55  ;;  %v2683_v55 = vsub.s32 0, %v2677_v16 }
 0x10e   : > { %1144 = vmatpush2.bf16.msra.mxu0 %v2031_v62  ;;  %v321_v62 = vld [vmem:[#allocation7] sm:$0x3] }
 0x10f   : > { %1145 = vmatprep.subr.bf16.mxu0 %v2033_v18  ;;  %v2689_v18 = vrot.slane %v320_v57, %v2683_v55 }
 0x112   : > { %1146 = vmatpush2.bf16.msra.mxu0 %v2037_v22 }
 0x113   : > { %1147 = vmatprep.subr.bf16.mxu0 %v2039_v24  ;;  %v2694_v24 = vrot.slane %v321_v62, %v2680_v54 }
 0x116   : > { %1148 = vmatpush2.bf16.msra.mxu0 %v2043_v1 }
 0x117   : > { %1149 = vmatprep.subr.bf16.mxu0 %v2045_v26  ;;  %v2699_v26 = vrot.slane %v321_v62, %v2683_v55 }
 0x11a   : > { %1150 = vmatpush2.bf16.msra.mxu0 %v2049_v30 }
 0x11b   : > { %1151 = vmatprep.subr.bf16.mxu0 %v2051_v32 }
 0x11e   : > { %1152 = vmatpush2.bf16.msra.mxu0 %v2055_v5 }
 0x11f   : > { %1267 = vmatprep.subr.bf16.mxu0 %v2059_v34 }
 0x186   : > { %v389_v8 = vpop.xlane.xlu0 %388 }
 0x187   : > { %v411_v36 = vmul.f32 0.00390625, %v389_v8 }
 0x189   : > { %v419_v39 = vadd.f32 1e-05, %v411_v36 }
 0x18a   : > { %v392_v40 = vpop.xlane.xlu1 %391  ;;  %v395_v41 = vpop.xlane.xlu0 %394 }
 0x18b   : > { %2105 = vrsqrt.f32 %v419_v39  ;;  %v412_v42 = vmul.f32 0.00390625, %v392_v40  ;;  %v413_v12 = vmul.f32 0.00390625, %v395_v41  ;;  %v2057_v41 = vld [vmem:[#allocation8 + $0x160] ss:$24 sps:$4 sm:$0xff]  }
 0x18d   : > { %v420_v43 = vadd.f32 1e-05, %v412_v42  ;;  %v421_v14 = vadd.f32 1e-05, %v413_v12 }
 0x18e   : > { %v398_v15 = vpop.xlane.xlu1 %397  ;;  %v401_v46 = vpop.xlane.xlu0 %400 }
 0x18f   : > { %2107 = vrsqrt.f32 %v420_v43  ;;  %v414_v49 = vmul.f32 0.00390625, %v398_v15  ;;  %v415_v50 = vmul.f32 0.00390625, %v401_v46 }
 0x190   : > { %2109 = vrsqrt.f32 %v421_v14  ;;  %v2062_v14 = vld [vmem:[#allocation8 + $0x134] ss:$24 sps:$4 sm:$0xff]  }
 0x191   : > { %v422_v17 = vadd.f32 1e-05, %v414_v49  ;;  %v423_v51 = vadd.f32 1e-05, %v415_v50  ;;  %v2060_v49 = vld [vmem:[#allocation8 + $0x130] ss:$24 sps:$4 sm:$0xff]  }
 0x192   : > { %v404_v19 = vpop.xlane.xlu1 %403  ;;  %v407_v52 = vpop.xlane.xlu0 %406 }
 0x193   : > { %2111 = vrsqrt.f32 %v422_v17  ;;  %v416_v53 = vmul.f32 0.00390625, %v404_v19  ;;  %v417_v20 = vmul.f32 0.00390625, %v407_v52  ;;  %v2065_v19 = vld [vmem:[#allocation8 + $0x104] ss:$24 sps:$4 sm:$0xff]  }
 0x194   : > { %2113 = vrsqrt.f32 %v423_v51 }
 0x195   : > { %v424_v56 = vadd.f32 1e-05, %v416_v53  ;;  %v425_v61 = vadd.f32 1e-05, %v417_v20 }
 0x196   : > { %v410_v58 = vpop.xlane.xlu1 %409 }
 0x197   : > { %2115 = vrsqrt.f32 %v424_v56  ;;  %v418_v59 = vmul.f32 0.00390625, %v410_v58 }
 0x198   : > { %v2106_v60 = vpop.eup %2105 }
 0x199   : > { %v426_v21 = vadd.f32 1e-05, %v418_v59  ;;  %v436_v22 = vmul.f32 %v2106_v60, %v2601_v7  ;;  %v435_v23 = vmul.f32 %v2106_v60, %v2598_v3  ;;  %v2063_v59 = vld [vmem:[#allocation8 + $0x100] ss:$24 sps:$4 sm:$0xff]  }
 0x19b   : > { %2117 = vrsqrt.f32 %v426_v21  ;;  %v463_v1 = vmul.f32 %v2686_v63, %v436_v22  ;;  %v462_v2 = vmul.f32 %v2689_v18, %v435_v23  ;;  %v2068_v21 = vld [vmem:[#allocation8 + $0xd4] ss:$24 sps:$4 sm:$0xff]   ;;  %v2066_v23 = vld [vmem:[#allocation8 + $0xd0] ss:$24 sps:$4 sm:$0xff]  }
 0x19c   : > { %v2108_v0 = vpop.eup %2107  ;;  %2119 = vrsqrt.f32 %v425_v61 }
 0x19d   : > { %v2110_v29 = vpop.eup %2109  ;;  %v438_v30 = vmul.f32 %v2108_v0, %v2621_v4  ;;  %v437_v7 = vmul.f32 %v2108_v0, %v2618_v25  ;;  %v490_v5 = vadd.f32 %v2694_v24, %v463_v1  ;;  %v489_v6 = vadd.f32 %v2699_v26, %v462_v2  ;;  %v2071_v0 = vld [vmem:[#allocation8 + $0xa4] ss:$24 sps:$4 sm:$0xff]  }
 0x19e   : > { %v440_v3 = vmul.f32 %v2110_v29, %v2607_v11  ;;  %v439_v39 = vmul.f32 %v2110_v29, %v2604_v10 }
 0x19f   : > { %v465_v31 = vmul.f32 %v2686_v63, %v438_v30  ;;  %v464_v32 = vmul.f32 %v2689_v18, %v437_v7 }
 0x1a0   : > { %v2112_v33 = vpop.eup %2111  ;;  %v467_v34 = vmul.f32 %v2686_v63, %v440_v3  ;;  %v2069_v3 = vld [vmem:[#allocation8 + $0xa0] ss:$24 sps:$4 sm:$0xff]  }
 0x1a1   : > { %v2114_v8 = vpop.eup %2113  ;;  %v492_v36 = vadd.f32 %v2694_v24, %v465_v31  ;;  %v491_v4 = vadd.f32 %v2699_v26, %v464_v32  ;;  %v442_v25 = vmul.f32 %v2112_v33, %v2627_v28  ;;  %v441_v11 = vmul.f32 %v2112_v33, %v2624_v27 }
 0x1a2   : > { %v444_v13 = vmul.f32 %v2114_v8, %v2641_v35  ;;  %v494_v27 = vadd.f32 %v2694_v24, %v467_v34  ;;  %v466_v35 = vmul.f32 %v2689_v18, %v439_v39  ;;  %v443_v57 = vmul.f32 %v2114_v8, %v2638_v9  ;;  %v2075_v8 = vld [vmem:[#allocation8 + $0x40] ss:$24 sps:$4 sm:$0xff]   ;;  %v2084_v39 = vld [vmem:[#allocation8 + $0x2b0] ss:$24 sps:$4 sm:$0xff]  }
 0x1a3   : > { %v2714_v40 = vpack.c.bf16 %v492_v36, %v490_v5  ;;  %v2716_v42 = vpack.c.bf16 %v491_v4, %v489_v6  ;;  %v469_v12 = vmul.f32 %v2686_v63, %v442_v25  ;;  %v468_v15 = vmul.f32 %v2689_v18, %v441_v11  ;;  %v2072_v5 = vld [vmem:[#allocation8 + $0x70] ss:$24 sps:$4 sm:$0xff]   ;;  %v2077_v6 = vld [vmem:[#allocation8 + $0x44] ss:$24 sps:$4 sm:$0xff]   ;;  %v2080_v36 = vld [vmem:[#allocation8 + $0x14] ss:$24 sps:$4 sm:$0xff]  }
 0x1a4   : > { %v2116_v43 = vpop.eup %2115  ;;  %v471_v50 = vmul.f32 %v2686_v63, %v444_v13  ;;  %v493_v20 = vadd.f32 %v2699_v26, %v466_v35  ;;  %v2078_v4 = vld [vmem:[#allocation8 + $0x10] ss:$24 sps:$4 sm:$0xff]   ;;  %v2083_v25 = vld [vmem:[#allocation8 + $0x2e4] ss:$24 sps:$4 sm:$0xff]   ;;  %v2086_v11 = vld [vmem:[#allocation8 + $0x2b4] ss:$24 sps:$4 sm:$0xff]  }
 0x1a5   : > { %1153 = vmatprep.mubr.bf16.mxu0 %v2714_v40  ;;  %1226 = vmatprep.mubr.bf16.mxu1 %v2714_v40  ;;  %v496_v10 = vadd.f32 %v2694_v24, %v469_v12  ;;  %v446_v28 = vmul.f32 %v2116_v43, %v2647_v38  ;;  %v495_v38 = vadd.f32 %v2699_v26, %v468_v15  ;;  %v2087_v12 = vld [vmem:[#allocation8 + $0x280] ss:$24 sps:$4 sm:$0xff]   ;;  %v2090_v13 = vld [vmem:[#allocation8 + $0x250] ss:$24 sps:$4 sm:$0xff]   ;;  %v2098_v15 = vld [vmem:[#allocation8 + $0x1f4] ss:$24 sps:$4 sm:$0xff]  }
 0x1a6   : > { %1154 = vmatmul.mubr.bf16.vlgmr.msra.gmra.mxu0 %v2716_v42  ;;  %1227 = vmatmul.mubr.bf16.vlgmr.msra.gmra.mxu1 %v2716_v42  ;;  %v445_v52 = vmul.f32 %v2116_v43, %v2644_v37  ;;  %v498_v60 = vadd.f32 %v2694_v24, %v471_v50  ;;  %v2095_v43 = vld [vmem:[#allocation8 + $0x224] ss:$24 sps:$4 sm:$0xff]   ;;  %v2104_v35 = vld [vmem:[#allocation8 + $0x194] ss:$24 sps:$4 sm:$0xff]   ;;  %v621_v50 = vsub.s32 2, %v2677_v16 }
 0x1a7   : > { %1268 = vmatpush1.bf16.msra.mxu0 %v2057_v41  ;;  %1827 = vmatpush1.bf16.msra.mxu1 %v2057_v41  ;;  %v2729_v46 = vpack.c.bf16 %v496_v10, %v494_v27  ;;  %v473_v17 = vmul.f32 %v2686_v63, %v446_v28  ;;  %v2742_v37 = vpack.c.bf16 %v495_v38, %v493_v20  ;;  %v2089_v41 = vld [vmem:[#allocation8 + $0x284] ss:$24 sps:$4 sm:$0xff]   ;;  %v2096_v27 = vld [vmem:[#allocation8 + $0x1f0] ss:$24 sps:$4 sm:$0xff]   ;;  %v2099_v28 = vld [vmem:[#allocation8 + $0x1c0] ss:$24 sps:$4 sm:$0xff]  }
 0x1a8   : > { %v2118_v51 = vpop.eup %2117  ;;  %1269 = vmatprep.subr.bf16.mxu0 %v2062_v14  ;;  %1812 = vmatprep.subr.bf16.mxu1 %v2062_v14  ;;  %v472_v61 = vmul.f32 %v2689_v18, %v445_v52  ;;  %v2093_v14 = vld [vmem:[#allocation8 + $0x220] ss:$24 sps:$4 sm:$0xff]   ;;  %v2101_v10 = vld [vmem:[#allocation8 + $0x1c4] ss:$24 sps:$4 sm:$0xff]  }
 0x1a9   : > { %v2120_v53 = vpop.eup %2119  ;;  %1163 = vmatprep.mubr.bf16.mxu0 %v2729_v46  ;;  %1236 = vmatprep.mubr.bf16.mxu1 %v2729_v46  ;;  %v500_v56 = vadd.f32 %v2694_v24, %v473_v17  ;;  %v450_v58 = vmul.f32 %v2118_v51, %v2667_v48  ;;  %v470_v48 = vmul.f32 %v2689_v18, %v443_v57  ;;  %v625_v17 = vsub.s32 3, %v2677_v16 }
 0x1aa   : > { %v448_v62 = vmul.f32 %v2120_v53, %v2661_v45  ;;  %v499_v1 = vadd.f32 %v2699_v26, %v472_v61  ;;  %v449_v2 = vmul.f32 %v2118_v51, %v2664_v47  ;;  %v447_v7 = vmul.f32 %v2120_v53, %v2658_v44  ;;  %v2074_v47 = vld [vmem:[#allocation8 + $0x74] ss:$24 sps:$4 sm:$0xff]   ;;  %v2785_v51 = vld [vmem:[%s2929_s4] sm:$0x3f] }
 0x1ab   : > { %1270 = vmatpush1.bf16.msra.mxu0 %v2060_v49  ;;  %1828 = vmatpush1.bf16.msra.mxu1 %v2060_v49  ;;  %v510_v9 = vpack.c.bf16 %v500_v56, %v498_v60  ;;  %v477_v22 = vmul.f32 %v2686_v63, %v450_v58  ;;  %v497_v29 = vadd.f32 %v2699_v26, %v470_v48  ;;  %v2102_v49 = vld [vmem:[#allocation8 + $0x190] ss:$24 sps:$4 sm:$0xff]  }
 0x1ac   : > { %1271 = vmatprep.subr.bf16.mxu0 %v2065_v19  ;;  %1813 = vmatprep.subr.bf16.mxu1 %v2065_v19  ;;  %v475_v45 = vmul.f32 %v2686_v63, %v448_v62  ;;  %v476_v63 = vmul.f32 %v2689_v18, %v449_v2  ;;  %v474_v44 = vmul.f32 %v2689_v18, %v447_v7 }
 0x1ad   : > { %v504_v30 = vadd.f32 %v2694_v24, %v477_v22  ;;  %v2756_v31 = vpack.c.bf16 %v499_v1, %v497_v29  ;;  %v2796_v19 = vrot.slane %v2785_v51, %v2680_v54  ;;  %v2799_v38 = vrot.slane %v2785_v51, %v625_v17 }
 0x1ae   : > { %1164 = vmatmul.mubr.bf16.gmra.mxu0 %v2742_v37  ;;  %1237 = vmatmul.mubr.bf16.gmra.mxu1 %v2742_v37  ;;  %v502_v32 = vadd.f32 %v2694_v24, %v475_v45  ;;  %v503_v24 = vadd.f32 %v2699_v26, %v476_v63  ;;  %v501_v34 = vadd.f32 %v2699_v26, %v474_v44  ;;  %v2081_v26 = vld [vmem:[#allocation8 + $0x2e0] ss:$24 sps:$4 sm:$0xff]  }
 0x1af   : > { %1272 = vmatpush1.bf16.msra.mxu0 %v2063_v59  ;;  %1829 = vmatpush1.bf16.msra.mxu1 %v2063_v59 }
 0x1b0   : > { %1173 = vmatprep.mubr.bf16.mxu0 %v510_v9  ;;  %1246 = vmatprep.mubr.bf16.mxu1 %v510_v9  ;;  %v2762_v33 = vpack.c.bf16 %v504_v30, %v502_v32  ;;  %v2769_v18 = vpack.c.bf16 %v503_v24, %v501_v34 }
 0x1b1   : > { %1273 = vmatprep.subr.bf16.mxu0 %v2068_v21  ;;  %1814 = vmatprep.subr.bf16.mxu1 %v2068_v21 }
 0x1b3   : > { %1274 = vmatpush1.bf16.msra.mxu0 %v2066_v23  ;;  %1830 = vmatpush1.bf16.msra.mxu1 %v2066_v23 }
 0x1b4   : > { %1275 = vmatprep.subr.bf16.mxu0 %v2071_v0  ;;  %1815 = vmatprep.subr.bf16.mxu1 %v2071_v0 }
 0x1b6   : > { %1174 = vmatmul.mubr.bf16.gmra.mxu0 %v2756_v31  ;;  %1247 = vmatmul.mubr.bf16.gmra.mxu1 %v2756_v31 }
 0x1b7   : > { %1276 = vmatpush1.bf16.msra.mxu0 %v2069_v3  ;;  %1831 = vmatpush1.bf16.msra.mxu1 %v2069_v3 }
 0x1b8   : > { %1183 = vmatprep.mubr.bf16.mxu0 %v2762_v33  ;;  %1256 = vmatprep.mubr.bf16.mxu1 %v2762_v33 }
 0x1b9   : > { %1277 = vmatprep.subr.bf16.mxu0 %v2074_v47  ;;  %1816 = vmatprep.subr.bf16.mxu1 %v2074_v47 }
 0x1bb   : > { %1278 = vmatpush1.bf16.msra.mxu0 %v2072_v5  ;;  %1832 = vmatpush1.bf16.msra.mxu1 %v2072_v5 }
 0x1bc   : > { %1279 = vmatprep.subr.bf16.mxu0 %v2077_v6  ;;  %1817 = vmatprep.subr.bf16.mxu1 %v2077_v6 }
 0x1be   : > { %1184 = vmatmul.mubr.bf16.gmra.mxu0 %v2769_v18  ;;  %1257 = vmatmul.mubr.bf16.gmra.mxu1 %v2769_v18 }
 0x1bf   : > { %1280 = vmatpush1.bf16.msra.mxu0 %v2075_v8  ;;  %1833 = vmatpush1.bf16.msra.mxu1 %v2075_v8 }
 0x1c0   : > { %1299 = vmatprep.mubr.bf16.mxu0 %v2714_v40  ;;  %1319 = vmatprep.mubr.bf16.mxu1 %v510_v9  ;;  %v2092_v40 = vld [vmem:[#allocation8 + $0x254] ss:$24 sps:$4 sm:$0xff]  }
 0x1c1   : > { %1281 = vmatprep.subr.bf16.mxu0 %v2080_v36  ;;  %1818 = vmatprep.subr.bf16.mxu1 %v2080_v36 }
 0x1c3   : > { %1282 = vmatpush1.bf16.msra.mxu0 %v2078_v4  ;;  %1834 = vmatpush1.bf16.msra.mxu1 %v2078_v4 }
 0x1c4   : > { %1283 = vmatprep.subr.bf16.mxu0 %v2083_v25  ;;  %1819 = vmatprep.subr.bf16.mxu1 %v2083_v25 }
 0x1c7   : > { %1284 = vmatpush2.bf16.msra.mxu0 %v2081_v26  ;;  %1835 = vmatpush2.bf16.msra.mxu1 %v2081_v26 }
 0x1c8   : > { %1285 = vmatprep.subr.bf16.mxu0 %v2086_v11  ;;  %1820 = vmatprep.subr.bf16.mxu1 %v2086_v11 }
 0x1cb   : > { %1286 = vmatpush2.bf16.msra.mxu0 %v2084_v39  ;;  %1836 = vmatpush2.bf16.msra.mxu1 %v2084_v39 }
 0x1cc   : > { %1287 = vmatprep.subr.bf16.mxu0 %v2089_v41  ;;  %1821 = vmatprep.subr.bf16.mxu1 %v2089_v41 }
 0x1cf   : > { %1288 = vmatpush2.bf16.msra.mxu0 %v2087_v12  ;;  %1837 = vmatpush2.bf16.msra.mxu1 %v2087_v12 }
 0x1d0   : > { %1289 = vmatprep.subr.bf16.mxu0 %v2092_v40  ;;  %1822 = vmatprep.subr.bf16.mxu1 %v2092_v40 }
 0x1d3   : > { %1290 = vmatpush2.bf16.msra.mxu0 %v2090_v13  ;;  %1838 = vmatpush2.bf16.msra.mxu1 %v2090_v13 }
 0x1d4   : > { %1291 = vmatprep.subr.bf16.mxu0 %v2095_v43  ;;  %1823 = vmatprep.subr.bf16.mxu1 %v2095_v43 }
 0x1d7   : > { %1292 = vmatpush2.bf16.msra.mxu0 %v2093_v14  ;;  %1839 = vmatpush2.bf16.msra.mxu1 %v2093_v14 }
 0x1d8   : > { %1293 = vmatprep.subr.bf16.mxu0 %v2098_v15  ;;  %1824 = vmatprep.subr.bf16.mxu1 %v2098_v15 }
 0x1db   : > { %1294 = vmatpush2.bf16.msra.mxu0 %v2096_v27  ;;  %1840 = vmatpush2.bf16.msra.mxu1 %v2096_v27 }
 0x1dc   : > { %1295 = vmatprep.subr.bf16.mxu0 %v2101_v10  ;;  %1825 = vmatprep.subr.bf16.mxu1 %v2101_v10 }
 0x1df   : > { %1296 = vmatpush2.bf16.msra.mxu0 %v2099_v28  ;;  %1841 = vmatpush2.bf16.msra.mxu1 %v2099_v28 }
 0x1e0   : > { %1297 = vmatprep.subr.bf16.mxu0 %v2104_v35  ;;  %1826 = vmatprep.subr.bf16.mxu1 %v2104_v35 }
 0x1e3   : > { %1298 = vmatpush2.bf16.msra.mxu0 %v2102_v49  ;;  %1842 = vmatpush2.bf16.msra.mxu1 %v2102_v49 }
 0x1e6   : > { %1300 = vmatmul.mubr.bf16.vlgmr.msra.gmra.mxu0 %v2716_v42  ;;  %1320 = vmatmul.mubr.bf16.vlgmr.msra.gmra.mxu1 %v2756_v31  ;;  %v2789_v42 = vrot.slane %v2785_v51, %v2683_v55 }
 0x1e7   : > { %1309 = vmatprep.mubr.bf16.mxu0 %v2729_v46  ;;  %1329 = vmatprep.mubr.bf16.mxu1 %v2762_v33  ;;  %v2792_v46 = vrot.slane %v2785_v51, %v621_v50 }
 0x1ee   : > { %1310 = vmatmul.mubr.bf16.gmra.mxu0 %v2742_v37  ;;  %1330 = vmatmul.mubr.bf16.gmra.mxu1 %v2769_v18 }
 0x266   : > { %v1155_v52 = vpop.f32.mrf.mxu0  ;;  %v1228_v53 = vpop.f32.mrf.mxu1 }
 0x267   : > { %v1156_v57 = vadd.f32 %v1155_v52, %v2789_v42  ;;  %v1229_v55 = vadd.f32 %v1228_v53, %v2792_v46 }
 0x268   : > { %v1157_v20 = vpop.f32.mrf.mxu0  ;;  %v1230_v56 = vpop.f32.mrf.mxu1 }
 0x269   : > { %v1158_v58 = vadd.f32 %v1157_v20, %v2796_v19  ;;  %v1231_v59 = vadd.f32 %v1230_v56, %v2799_v38 }
 0x26a   : > { %v1159_v60 = vpop.f32.mrf.mxu0  ;;  %v1232_v37 = vpop.f32.mrf.mxu1 }
 0x26b   : > { %v1787_v54 = vpack.c.bf16 %v1158_v58, %v1156_v57  ;;  %v1788_v61 = vpack.c.bf16 %v1231_v59, %v1229_v55  ;;  %v1160_v9 = vadd.f32 %v1159_v60, %v2789_v42  ;;  %v1233_v48 = vadd.f32 %v1232_v37, %v2792_v46 }
 0x26c   : > { %v1161_v62 = vpop.f32.mrf.mxu0  ;;  %v1234_v21 = vpop.f32.mrf.mxu1 }
 0x26d   : > { %1484 = vst [vmem:[%s2806_s6] sm:$0xff] %v1787_v54  ;;  %1485 = vst [vmem:[%s2806_s6 + $0x8] sm:$0xff] %v1788_v61  ;;  %v1162_v22 = vadd.f32 %v1161_v62, %v2796_v19  ;;  %v1235_v23 = vadd.f32 %v1234_v21, %v2799_v38 }
 0x26e   : > { %v1165_v0 = vpop.f32.mrf.mxu0  ;;  %v1238_v1 = vpop.f32.mrf.mxu1 }
 0x26f   : > { %v1790_v45 = vpack.c.bf16 %v1162_v22, %v1160_v9  ;;  %v1791_v2 = vpack.c.bf16 %v1235_v23, %v1233_v48  ;;  %v1166_v7 = vadd.f32 %v1165_v0, %v2789_v42  ;;  %v1239_v3 = vadd.f32 %v1238_v1, %v2792_v46 }
 0x270   : > { %v1167_v29 = vpop.f32.mrf.mxu0  ;;  %v1240_v30 = vpop.f32.mrf.mxu1 }
 0x271   : > { %1487 = vst [vmem:[%s2806_s6 + $0x18] sm:$0xff] %v1790_v45  ;;  %1488 = vst [vmem:[%s2806_s6 + $0x20] sm:$0xff] %v1791_v2  ;;  %v1168_v31 = vadd.f32 %v1167_v29, %v2796_v19  ;;  %v1241_v32 = vadd.f32 %v1240_v30, %v2799_v38  ;;  %v629_v29 = vsub.s32 4, %v2677_v16  ;;  %v633_v30 = vsub.s32 5, %v2677_v16 }
 0x272   : > { %v1169_v63 = vpop.f32.mrf.mxu0  ;;  %v1242_v47 = vpop.f32.mrf.mxu1 }
 0x273   : > { %v1793_v33 = vpack.c.bf16 %v1168_v31, %v1166_v7  ;;  %v1794_v44 = vpack.c.bf16 %v1241_v32, %v1239_v3  ;;  %v1170_v24 = vadd.f32 %v1169_v63, %v2789_v42  ;;  %v1243_v34 = vadd.f32 %v1242_v47, %v2792_v46 }
 0x274   : > { %v1171_v5 = vpop.f32.mrf.mxu0  ;;  %v1244_v6 = vpop.f32.mrf.mxu1  ;;  %v630_v7 = vrot.slane %v2785_v51, %v629_v29  ;;  %v634_v3 = vrot.slane %v2785_v51, %v633_v30 }
 0x275   : > { %1490 = vst [vmem:[%s2806_s6 + $0x30] sm:$0xff] %v1793_v33  ;;  %1491 = vst [vmem:[%s2806_s6 + $0x38] sm:$0xff] %v1794_v44  ;;  %v1172_v8 = vadd.f32 %v1171_v5, %v2796_v19  ;;  %v1245_v18 = vadd.f32 %v1244_v6, %v2799_v38 }
 0x276   : > { %v1175_v36 = vpop.f32.mrf.mxu0  ;;  %v1248_v4 = vpop.f32.mrf.mxu1 }
 0x277   : > { %v1796_v25 = vpack.c.bf16 %v1172_v8, %v1170_v24  ;;  %v1797_v26 = vpack.c.bf16 %v1245_v18, %v1243_v34  ;;  %v1176_v41 = vadd.f32 %v1175_v36, %v2789_v42  ;;  %v1249_v12 = vadd.f32 %v1248_v4, %v2792_v46 }
 0x278   : > { %v1177_v11 = vpop.f32.mrf.mxu0  ;;  %v1250_v39 = vpop.f32.mrf.mxu1 }
 0x279   : > { %1493 = vst [vmem:[%s2806_s6 + $0x48] sm:$0xff] %v1796_v25  ;;  %1494 = vst [vmem:[%s2806_s6 + $0x50] sm:$0xff] %v1797_v26  ;;  %v1178_v40 = vadd.f32 %v1177_v11, %v2796_v19  ;;  %v1251_v13 = vadd.f32 %v1250_v39, %v2799_v38 }
 0x27a   : > { %v1179_v43 = vpop.f32.mrf.mxu0  ;;  %v1252_v14 = vpop.f32.mrf.mxu1 }
 0x27b   : > { %v1799_v15 = vpack.c.bf16 %v1178_v40, %v1176_v41  ;;  %v1800_v27 = vpack.c.bf16 %v1251_v13, %v1249_v12  ;;  %v1180_v35 = vadd.f32 %v1179_v43, %v2789_v42  ;;  %v1253_v49 = vadd.f32 %v1252_v14, %v2792_v46 }
 0x27c   : > { %v1181_v10 = vpop.f32.mrf.mxu0  ;;  %v1254_v28 = vpop.f32.mrf.mxu1 }
 0x27d   : > { %1496 = vst [vmem:[%s2806_s6 + $0x60] sm:$0xff] %v1799_v15  ;;  %1497 = vst [vmem:[%s2806_s6 + $0x68] sm:$0xff] %v1800_v27  ;;  %v1182_v50 = vadd.f32 %v1181_v10, %v2796_v19  ;;  %v1255_v17 = vadd.f32 %v1254_v28, %v2799_v38 }
 0x27e   : > { %v1185_v52 = vpop.f32.mrf.mxu0  ;;  %v1258_v53 = vpop.f32.mrf.mxu1 }
 0x27f   : > { %v1802_v20 = vpack.c.bf16 %v1182_v50, %v1180_v35  ;;  %v1803_v56 = vpack.c.bf16 %v1255_v17, %v1253_v49  ;;  %v1186_v58 = vadd.f32 %v1185_v52, %v2789_v42  ;;  %v1259_v59 = vadd.f32 %v1258_v53, %v2792_v46 }
 0x280   : > { %v1187_v57 = vpop.f32.mrf.mxu0  ;;  %v1260_v55 = vpop.f32.mrf.mxu1 }
 0x281   : > { %1499 = vst [vmem:[%s2806_s6 + $0x78] sm:$0xff] %v1802_v20  ;;  %1500 = vst [vmem:[%s2806_s6 + $0x80] sm:$0xff] %v1803_v56  ;;  %v1188_v60 = vadd.f32 %v1187_v57, %v2796_v19  ;;  %v1261_v37 = vadd.f32 %v1260_v55, %v2799_v38 }
 0x282   : > { %v1189_v54 = vpop.f32.mrf.mxu0  ;;  %v1262_v61 = vpop.f32.mrf.mxu1 }
 0x283   : > { %v1805_v62 = vpack.c.bf16 %v1188_v60, %v1186_v58  ;;  %v1806_v21 = vpack.c.bf16 %v1261_v37, %v1259_v59  ;;  %v1190_v22 = vadd.f32 %v1189_v54, %v2789_v42  ;;  %v1263_v23 = vadd.f32 %v1262_v61, %v2792_v46 }
 0x284   : > { %v1191_v9 = vpop.f32.mrf.mxu0  ;;  %v1264_v48 = vpop.f32.mrf.mxu1 }
 0x285   : > { %1502 = vst [vmem:[%s2806_s6 + $0x90] sm:$0xff] %v1805_v62  ;;  %1503 = vst [vmem:[%s2806_s6 + $0x98] sm:$0xff] %v1806_v21  ;;  %v1192_v0 = vadd.f32 %v1191_v9, %v2796_v19  ;;  %v1265_v1 = vadd.f32 %v1264_v48, %v2799_v38 }
 0x287   : > { %v1808_v45 = vpack.c.bf16 %v1192_v0, %v1190_v22  ;;  %v1809_v2 = vpack.c.bf16 %v1265_v1, %v1263_v23 }
 0x289   : > { %1505 = vst [vmem:[%s2806_s6 + $0xa8] sm:$0xff] %v1808_v45  ;;  %1506 = vst [vmem:[%s2806_s6 + $0xb0] sm:$0xff] %v1809_v2 }
 0x2a6   : > { %v1301_v42 = vpop.f32.mrf.mxu0  ;;  %v1321_v46 = vpop.f32.mrf.mxu1 }
 0x2a7   : > { %v1302_v38 = vadd.f32 %v1301_v42, %v630_v7  ;;  %v1322_v32 = vadd.f32 %v1321_v46, %v630_v7 }
 0x2a8   : > { %v1303_v19 = vpop.f32.mrf.mxu0  ;;  %v1323_v31 = vpop.f32.mrf.mxu1 }
 0x2a9   : > { %v1304_v63 = vadd.f32 %v1303_v19, %v634_v3  ;;  %v1324_v47 = vadd.f32 %v1323_v31, %v634_v3 }
 0x2aa   : > { %v1305_v33 = vpop.f32.mrf.mxu0  ;;  %v1325_v44 = vpop.f32.mrf.mxu1 }
 0x2ab   : > { %v1789_v5 = vpack.c.bf16 %v1304_v63, %v1302_v38  ;;  %v1801_v16 = vpack.c.bf16 %v1324_v47, %v1322_v32  ;;  %v1306_v51 = vadd.f32 %v1305_v33, %v630_v7  ;;  %v1326_v34 = vadd.f32 %v1325_v44, %v630_v7 }
 0x2ac   : > { %v1307_v6 = vpop.f32.mrf.mxu0  ;;  %v1327_v24 = vpop.f32.mrf.mxu1 }
 0x2ad   : > { %1486 = vst [vmem:[%s2806_s6 + $0x10] sm:$0xff] %v1789_v5  ;;  %1498 = vst [vmem:[%s2806_s6 + $0x70] sm:$0xff] %v1801_v16  ;;  %v1308_v8 = vadd.f32 %v1307_v6, %v634_v3  ;;  %v1328_v18 = vadd.f32 %v1327_v24, %v634_v3 }
 0x2ae   : > { %v1311_v36 = vpop.f32.mrf.mxu0  ;;  %v1331_v4 = vpop.f32.mrf.mxu1 }
 0x2af   : > { %v1792_v25 = vpack.c.bf16 %v1308_v8, %v1306_v51  ;;  %v1804_v26 = vpack.c.bf16 %v1328_v18, %v1326_v34  ;;  %v1312_v41 = vadd.f32 %v1311_v36, %v630_v7  ;;  %v1332_v12 = vadd.f32 %v1331_v4, %v630_v7 }
 0x2b0   : > { %v1313_v11 = vpop.f32.mrf.mxu0  ;;  %v1333_v39 = vpop.f32.mrf.mxu1 }
 0x2b1   : > { %1489 = vst [vmem:[%s2806_s6 + $0x28] sm:$0xff] %v1792_v25  ;;  %1501 = vst [vmem:[%s2806_s6 + $0x88] sm:$0xff] %v1804_v26  ;;  %v1314_v40 = vadd.f32 %v1313_v11, %v634_v3  ;;  %v1334_v13 = vadd.f32 %v1333_v39, %v634_v3 }
 0x2b2   : > { %v1315_v43 = vpop.f32.mrf.mxu0  ;;  %v1335_v14 = vpop.f32.mrf.mxu1 }
 0x2b3   : > { %v1795_v15 = vpack.c.bf16 %v1314_v40, %v1312_v41  ;;  %v1807_v27 = vpack.c.bf16 %v1334_v13, %v1332_v12  ;;  %v1316_v35 = vadd.f32 %v1315_v43, %v630_v7  ;;  %v1336_v49 = vadd.f32 %v1335_v14, %v630_v7 }
 0x2b4   : > { %v1317_v10 = vpop.f32.mrf.mxu0  ;;  %v1337_v28 = vpop.f32.mrf.mxu1 }
 0x2b5   : > { %1492 = vst [vmem:[%s2806_s6 + $0x40] sm:$0xff] %v1795_v15  ;;  %1504 = vst [vmem:[%s2806_s6 + $0xa0] sm:$0xff] %v1807_v27  ;;  %v1318_v50 = vadd.f32 %v1317_v10, %v634_v3  ;;  %v1338_v17 = vadd.f32 %v1337_v28, %v634_v3 }
 0x2b7   : > { %v1798_v52 = vpack.c.bf16 %v1318_v50, %v1316_v35  ;;  %v1810_v53 = vpack.c.bf16 %v1338_v17, %v1336_v49 }
 0x2b9   : > { %1495 = vst [vmem:[%s2806_s6 + $0x58] sm:$0xff] %v1798_v52  ;;  %1507 = vst [vmem:[%s2806_s6 + $0xb8] sm:$0xff] %v1810_v53 }
 0x2ba   : > { %2240 = shalt.err (!%p2237_p11)
}
 0x2bb   : > { %s2241_s16 = scalar_lea.hbm %s2870_s11, 3072  ;;  %s2245_s1 = scalar_lea.hbm %s2930_s5, 12288 }
 0x2bc   : > { %p2242_p5 = scmp.ne.s32.totalorder %s2870_s11, %s2241_s16  ;;  %p2246_p12 = scmp.lt.s32.totalorder %s2870_s11, %s2930_s5 }
 0x2bd   : > { %p2247_p10 = scmp.lt.s32.totalorder %s2245_s1, %s2241_s16 }
 0x2be   : > { %p2243_p7 = pnand %p2242_p5, %p2496_p13 }
 0x2bf   : > { %p2248_p0 = por %p2247_p10, %p2246_p12 }
 0x2c0   : > { %p2244_p9 = pneg %p2243_p7 }
 0x2c2   : > { %p2249_p1 = pnand %p2248_p0, %p2244_p9 }
 0x2c4   : > { %2252 = shalt.err (!%p2249_p1)
}
 0x2c5   : > { %s2342_s6 = smov 384   ;;  %s2343_s7 = smov 24  }
 0x2c6   : > { %1860 = dma.vmem_to_hbm [thread:$0]  (%p2496_p13), %s2865_s22, 3072, %s2870_s11, %s1509_s26, %s2342_s6, %s2342_s6, %s2343_s7  }
 0x2c7 PF: > { %s2962_s29 = sld [smem:[#allocation15_spill]]  ;;  %p1887_p6 = scmp.ge.s32.totalorder %s2331_s25, 2 }
 0x2c8   : > { %s2963_s21 = sld [smem:[#allocation17_spill]] }
 0x2cd   : > { %s1540_s15 = sand.u32 1, %s2962_s29  }
 0x2ce   : > { %p2964_p3 = scmp.ne.s32.totalorder %s2963_s21, 0  ;;  %s1541_s27 = scalar_lea.sflag [#allocation4], %s1540_s15 }
 0x2d0   : > { %p1877_p4 = pnand %p1887_p6, %p2964_p3 }
 0x2d2   : > { %p1878_p2 = pneg %p1877_p4 }
 0x2d4   : > { %2298 = dma.done.wait (%p1878_p2), %s1541_s27, 3072  }
 0x2d5   : > { %2300 = vsyncadd (%p1878_p2), %s1541_s27, 4294964224  ;;  %s23_s25 = sadd.s32 1, %s2331_s25   ;;  %s2965_s21 = sld [smem:[#allocation16_spill]] }
 0x2d6   : > { %p20_p8 = scmp.ge.s32.totalorder %s23_s25, 6   ;;  %s2966_s23 = sld [smem:[#allocation18_spill]] }
 0x2d7   : > { %s2967_s18 = smov %s2307_s19  ;;  %s2968_s19 = smov %s2311_s20 }
 0x2d8   : > { %s2969_s20 = smov %s2513_s2  ;;  %s2970_s22 = smov %s2327_s24 }
 0x2d9   : > { %s2971_s24 = smov %s2977_s17  ;;  %22 = sbr.rel (!%p20_p8) target bundleno = 13 (0xd), region = 97 }
 0x2de   :  { %1546 = vsyncpa [#allocation3], 1 }
 0x2df   :  { %1548 = vsyncpa [#allocation3 + $0x1], 1 }
 0x2e0   :  { %1549 = vsyncpa [#allocation6], 1 }
 0x2e1   :  { %1550 = vsyncpa [#allocation9], 1 }
 0x2e2   :  { %1551 = vsyncpa [#allocation4], 1 }
 0x2e3   :  { %1553 = vsyncpa [#allocation4 + $0x1], 1 }

</bundles_post_ra>
